<compile_context>
chip_gen: v7x
topology: tpu7x:2x2x1
jax: 0.10.0
libtpu: 0.0.40
codegen_flags: <defaults>
</compile_context>

<pallas_src>
import functools

import jax
import jax.numpy as jnp
from jax.experimental import pallas as pl
from jax.experimental.pallas import tpu as pltpu


# ----------------------------- kernel ---------------------------------------


def _bn_silu(y, s, b):
    # folded (eval-mode) BatchNorm scale/bias followed by SiLU = y * sigmoid(y)
    y = y * s + b
    return y * jax.nn.sigmoid(y)


def elan_kernel(n_layers, seq_len,
                x_ref,
                w01_ref, s01_ref, b01_ref,
                w2_ref, s2_ref, b2_ref,
                w3_ref, s3_ref, b3_ref,
                w5_ref, s5_ref, b5_ref,
                o_ref):
    x = x_ref[...]                           # (tm, C) bf16, tm = whole sequences
    tm = x.shape[0]
    C2 = w2_ref.shape[-1]

    # Sequence-boundary masks, built once per tile from a (tm, 1) iota and
    # hoisted out of both layer loops.  Row i has no valid "previous" row at
    # the start of a sequence and no valid "next" row at the end (zero pad).
    pos = jax.lax.broadcasted_iota(jnp.int32, (tm, 1), 0) % seq_len
    not_first = jnp.broadcast_to(pos != 0, (tm, C2))
    not_last = jnp.broadcast_to(pos != (seq_len - 1), (tm, C2))

    def conv3(h, w):
        # h: (tm, C2) f32.  w: (3*C2, C2) bf16, rows = [prev tap; center; next].
        # Three accumulating MXU dots (no (tm, 3*C2) concat slab).
        h_prev = jnp.where(not_first, pltpu.roll(h, 1, axis=0), 0.0)
        h_next = jnp.where(not_last, pltpu.roll(h, tm - 1, axis=0), 0.0)
        y = jnp.dot(h.astype(jnp.bfloat16), w[C2:2 * C2],
                    preferred_element_type=jnp.float32)
        y = y + jnp.dot(h_prev.astype(jnp.bfloat16), w[0:C2],
                        preferred_element_type=jnp.float32)
        y = y + jnp.dot(h_next.astype(jnp.bfloat16), w[2 * C2:3 * C2],
                        preferred_element_type=jnp.float32)
        return y

    def sequential(w_ref, s_ref, b_ref, h0):
        def body(i, h):
            return _bn_silu(conv3(h, w_ref[i]), s_ref[i], b_ref[i])
        unroll = True if n_layers <= 4 else 2   # cap unroll for deep chains
        return jax.lax.fori_loop(0, n_layers, body, h0, unroll=unroll)

    # cbs0 + cbs1 fused into one 1x1 matmul; x01 = [x0 | x1] along channels.
    x01 = _bn_silu(jnp.dot(x, w01_ref[...], preferred_element_type=jnp.float32),
                   s01_ref[...], b01_ref[...])
    x1 = x01[:, C2:2 * C2]

    # cbs5 rewritten as split-w5 accumulation (no channel concat); the x0 and
    # x1 contributions come from a single dot against w5[:2*C2].
    w5 = w5_ref[...]
    acc = jnp.dot(x01.astype(jnp.bfloat16), w5[0:2 * C2],
                  preferred_element_type=jnp.float32)

    # sequential2 / sequential3 : n x (3-tap conv + bn + silu)
    x2 = sequential(w2_ref, s2_ref, b2_ref, x1)
    acc = acc + jnp.dot(x2.astype(jnp.bfloat16), w5[2 * C2:3 * C2],
                        preferred_element_type=jnp.float32)

    x3 = sequential(w3_ref, s3_ref, b3_ref, x2)
    acc = acc + jnp.dot(x3.astype(jnp.bfloat16), w5[3 * C2:4 * C2],
                        preferred_element_type=jnp.float32)

    o_ref[...] = _bn_silu(acc, s5_ref[...], b5_ref[...])


# ----------------------------- wrapper ---------------------------------------


def elan_pallas(x_nlc, params, n_layers, *, seqs_per_tile=None):
    """x_nlc: (N, L, C) float32. Returns (N, L, 2*C) float32."""
    N, L, C = x_nlc.shape
    C2 = C // 2
    Cout = 2 * C
    M = N * L
    num_seqs = N

    # Input activations moved in bf16 (halves HBM traffic; matmuls are bf16).
    x2d = x_nlc.reshape(M, C).astype(jnp.bfloat16)

    # -------- tile sizing: whole sequences per tile, VMEM-aware -------------
    if seqs_per_tile is None:
        # rough live f32/bf16 intermediates + double-buffered I/O, bytes/row
        bytes_per_row = 4 * (2 * C + 4 * C2 + 2 * Cout) + 2 * (C + Cout)
        budget = 8 * 1024 * 1024          # conservative: fits v7x 64 MiB / TC
        target_rows = max(L, min(1024, budget // max(bytes_per_row, 1)))
        seqs_per_tile = max(1, min(num_seqs, target_rows // L))
    seqs_per_tile = min(seqs_per_tile, num_seqs)
    # sublane alignment: bf16 input block wants tm % 16 == 0 (unless tm == M)
    while seqs_per_tile < num_seqs and (seqs_per_tile * L) % 16 != 0:
        seqs_per_tile += 1
    tm = seqs_per_tile * L
    assert tm == M or tm % 16 == 0, (tm, L)

    weight_args = (
        params["w01"], params["s01"], params["b01"],
        params["w2"], params["s2"], params["b2"],
        params["w3"], params["s3"], params["b3"],
        params["w5"], params["s5"], params["b5"],
    )

    def full_spec(a):
        nd = a.ndim
        return pl.BlockSpec(a.shape, lambda i, nd=nd: (0,) * nd)

    in_specs = [pl.BlockSpec((tm, C), lambda i: (i, 0))]
    in_specs += [full_spec(a) for a in weight_args]
    out_spec = pl.BlockSpec((tm, Cout), lambda i: (i, 0))

    # Explicit VMEM limit: per-tile estimate with pipelining headroom, clamped
    # to stay safe on v5e (16 MiB scoped default) and v7x (64 MiB physical).
    weight_bytes = sum(int(a.size) * a.dtype.itemsize for a in weight_args)
    est = tm * (4 * (2 * C + 4 * C2 + 2 * Cout) + 2 * (C + Cout)) + 2 * weight_bytes
    vmem_limit = int(min(max(4 * est, 16 * 1024 * 1024), 48 * 1024 * 1024))

    kernel = functools.partial(elan_kernel, n_layers, L)

    out2d = pl.pallas_call(
        kernel,
        out_shape=jax.ShapeDtypeStruct((M, Cout), jnp.float32),
        grid=(pl.cdiv(M, tm),),
        in_specs=in_specs,
        out_specs=out_spec,
        compiler_params=pltpu.CompilerParams(
            dimension_semantics=("parallel",),
            vmem_limit_bytes=vmem_limit),
    )(x2d, *weight_args)

    return out2d.reshape(N, L, Cout)


# -------------------------- parameter setup ----------------------------------


def make_params(key, in_, n_layers, eps=1e-5):
    """Deterministic synthetic weights. BN is eval-mode, folded to scale/bias.

    Packing (done here, NOT in-kernel):
      * cbs0/cbs1 fused: w01 = [w0 | w1]  -> (C, 2*C2) bf16, s01/b01 (1, 2*C2)
      * 3-tap conv weights: (n, 3*C2, C2) bf16, rows = [prev tap; center; next]
      * cbs5 weight: (4*C2, Cout) bf16; row blocks match concat order
        [x0, x1, x2, x3], so the kernel slices it statically.
    """
    C = in_
    C2 = C // 2
    Cout = 2 * C
    keys = iter(jax.random.split(key, 128))

    def bn_fold(c):
        gamma = 1.0 + 0.1 * jax.random.normal(next(keys), (c,), jnp.float32)
        beta = 0.1 * jax.random.normal(next(keys), (c,), jnp.float32)
        mean = 0.1 * jax.random.normal(next(keys), (c,), jnp.float32)
        var = jnp.abs(jax.random.normal(next(keys), (c,), jnp.float32)) + 0.5
        scale = gamma / jnp.sqrt(var + eps)
        bias = beta - mean * scale
        return scale.reshape(1, c), bias.reshape(1, c)

    def w1x1(cin, cout):
        # torch Conv1d weight (cout, cin, 1) -> packed as (cin, cout)
        return 0.1 * jax.random.normal(next(keys), (cin, cout), jnp.float32)

    def w3taps(cin, cout):
        # torch Conv1d weight (cout, cin, 3) -> packed as (3*cin, cout)
        w = 0.1 * jax.random.normal(next(keys), (3, cin, cout), jnp.float32)
        return w.reshape(3 * cin, cout)

    p = {}
    w0 = w1x1(C, C2)
    s0, b0 = bn_fold(C2)
    w1 = w1x1(C, C2)
    s1, b1 = bn_fold(C2)
    p["w01"] = jnp.concatenate([w0, w1], axis=1).astype(jnp.bfloat16)
    p["s01"] = jnp.concatenate([s0, s1], axis=1)
    p["b01"] = jnp.concatenate([b0, b1], axis=1)

    def stack_layers():
        ws, ss, bs = [], [], []
        for _ in range(n_layers):
            ws.append(w3taps(C2, C2))
            s, b = bn_fold(C2)
            ss.append(s)
            bs.append(b)
        return (jnp.stack(ws).astype(jnp.bfloat16), jnp.stack(ss), jnp.stack(bs))

    p["w2"], p["s2"], p["b2"] = stack_layers()
    p["w3"], p["s3"], p["b3"] = stack_layers()

    w5_full = 0.1 * jax.random.normal(next(keys), (Cout, Cout), jnp.float32)
    p["w5"] = w5_full.astype(jnp.bfloat16)        # (4*C2, Cout), row-split in-kernel
    p["s5"], p["b5"] = bn_fold(Cout)
    return p


# --------------------------- pure-JAX reference -------------------------------


def elan_reference(x_nlc, p, n_layers):
    silu = jax.nn.silu
    f32 = jnp.float32
    C2 = p["w2"].shape[-1]

    def cbs1x1(x, w, s, b):
        return silu(jnp.einsum("nlc,cd->nld", x, w.astype(f32)) * s + b)

    def cbs3(x, w_packed, s, b):
        w = w_packed.astype(f32).reshape(3, C2, C2)
        xp = jnp.pad(x, ((0, 0), (1, 1), (0, 0)))
        L = x.shape[1]
        y = sum(jnp.einsum("nlc,cd->nld", xp[:, k:k + L], w[k]) for k in range(3))
        return silu(y * s + b)

    x01 = cbs1x1(x_nlc, p["w01"], p["s01"], p["b01"])
    x0 = x01[..., :C2]
    x1 = x01[..., C2:]
    h = x1
    for i in range(n_layers):
        h = cbs3(h, p["w2"][i], p["s2"][i], p["b2"][i])
    x2 = h
    for i in range(n_layers):
        h = cbs3(h, p["w3"][i], p["s3"][i], p["b3"][i])
    x3 = h
    cat = jnp.concatenate([x0, x1, x2, x3], axis=-1)
    return cbs1x1(cat, p["w5"], p["s5"], p["b5"])


# ----------------------------------- main -------------------------------------


if __name__ == "__main__":
    # small shapes: batch=4, in_ channels=16, sequence length=32, n=2 blocks
    N, IN_, L, N_LAYERS = 4, 16, 32, 2

    key = jax.random.PRNGKey(0)
    kx, kp = jax.random.split(key)

    # PyTorch input would be (N, C, L); the kernel layout is (N, L, C).
    x_ncl = jax.random.normal(kx, (N, IN_, L), jnp.float32)
    x_nlc = jnp.transpose(x_ncl, (0, 2, 1))

    params = make_params(kp, IN_, N_LAYERS)

    # seqs_per_tile=2 -> tm = 64 rows/tile, grid = 2 (exercises pipelining +
    # megacore sharding at toy scale; production sizes auto-pick larger tiles).
    out = elan_pallas(x_nlc, params, N_LAYERS, seqs_per_tile=2)
    out = jax.block_until_ready(out)

    ref = elan_reference(x_nlc, params, N_LAYERS)
    assert out.shape == (N, L, 2 * IN_), out.shape
    max_err = float(jnp.max(jnp.abs(out - ref)))
    # bf16 matmul operands vs f32 reference math -> loose tolerance
    assert jnp.allclose(out, ref, atol=5e-2, rtol=5e-2), max_err

    print("KERNEL_OK")
</pallas_src>

<mosaic_0001>
module attributes {stable_mosaic.version = 11 : i64} {
  func.func @elan_kernel(%arg0: i32, %arg1: memref<64x16xbf16, #tpu.memory_space<vmem>>, %arg2: memref<16x16xbf16, #tpu.memory_space<vmem>>, %arg3: memref<1x16xf32, #tpu.memory_space<vmem>>, %arg4: memref<1x16xf32, #tpu.memory_space<vmem>>, %arg5: memref<2x24x8xbf16, #tpu.memory_space<vmem>>, %arg6: memref<2x1x8xf32, #tpu.memory_space<vmem>>, %arg7: memref<2x1x8xf32, #tpu.memory_space<vmem>>, %arg8: memref<2x24x8xbf16, #tpu.memory_space<vmem>>, %arg9: memref<2x1x8xf32, #tpu.memory_space<vmem>>, %arg10: memref<2x1x8xf32, #tpu.memory_space<vmem>>, %arg11: memref<32x32xbf16, #tpu.memory_space<vmem>>, %arg12: memref<1x32xf32, #tpu.memory_space<vmem>>, %arg13: memref<1x32xf32, #tpu.memory_space<vmem>>, %arg14: memref<64x32xf32, #tpu.memory_space<vmem>>) attributes {dimension_semantics = [#tpu.dimension_semantics<parallel>], iteration_bounds = array<i64: 2>, scalar_prefetch = 0 : i64, scratch_operands = 0 : i64, tpu.core_type = #tpu.core_type<tc>, window_params = [{transform_indices = @transform_0, window_bounds = array<i64: 64, 16>}, {pipeline_mode = #tpu.pipeline_mode<synchronous>, transform_indices = @transform_1, window_bounds = array<i64: 16, 16>}, {pipeline_mode = #tpu.pipeline_mode<synchronous>, transform_indices = @transform_2, window_bounds = array<i64: 1, 16>}, {pipeline_mode = #tpu.pipeline_mode<synchronous>, transform_indices = @transform_3, window_bounds = array<i64: 1, 16>}, {pipeline_mode = #tpu.pipeline_mode<synchronous>, transform_indices = @transform_4, window_bounds = array<i64: 2, 24, 8>}, {pipeline_mode = #tpu.pipeline_mode<synchronous>, transform_indices = @transform_5, window_bounds = array<i64: 2, 1, 8>}, {pipeline_mode = #tpu.pipeline_mode<synchronous>, transform_indices = @transform_6, window_bounds = array<i64: 2, 1, 8>}, {pipeline_mode = #tpu.pipeline_mode<synchronous>, transform_indices = @transform_7, window_bounds = array<i64: 2, 24, 8>}, {pipeline_mode = #tpu.pipeline_mode<synchronous>, transform_indices = @transform_8, window_bounds = array<i64: 2, 1, 8>}, {pipeline_mode = #tpu.pipeline_mode<synchronous>, transform_indices = @transform_9, window_bounds = array<i64: 2, 1, 8>}, {pipeline_mode = #tpu.pipeline_mode<synchronous>, transform_indices = @transform_10, window_bounds = array<i64: 32, 32>}, {pipeline_mode = #tpu.pipeline_mode<synchronous>, transform_indices = @transform_11, window_bounds = array<i64: 1, 32>}, {pipeline_mode = #tpu.pipeline_mode<synchronous>, transform_indices = @transform_12, window_bounds = array<i64: 1, 32>}, {transform_indices = @transform_13, window_bounds = array<i64: 64, 32>}]} {
    %c0 = arith.constant 0 : index
    %c0_0 = arith.constant 0 : index
    %0 = vector.load %arg1[%c0, %c0_0] : memref<64x16xbf16, #tpu.memory_space<vmem>>, vector<64x16xbf16>
    %1 = tpu.iota {dimensions = array<i32: 0>} : vector<64x1xi32>
    %c32_i32 = arith.constant 32 : i32
    %c0_i32 = arith.constant 0 : i32
    %2 = arith.cmpi eq, %c32_i32, %c0_i32 : i32
    %c1_i32 = arith.constant 1 : i32
    %3 = arith.select %2, %c1_i32, %c32_i32 : i32
    %4 = vector.broadcast %3 : i32 to vector<64x1xi32>
    %5 = arith.remsi %1, %4 : vector<64x1xi32>
    %c0_i32_1 = arith.constant 0 : i32
    %6 = vector.broadcast %c0_i32_1 : i32 to vector<64x1xi32>
    %7 = arith.cmpi ne, %5, %6 : vector<64x1xi32>
    %c0_i32_2 = arith.constant 0 : i32
    %8 = vector.broadcast %c0_i32_2 : i32 to vector<64x1xi32>
    %9 = arith.cmpi slt, %5, %8 : vector<64x1xi32>
    %c0_i32_3 = arith.constant 0 : i32
    %10 = arith.cmpi slt, %3, %c0_i32_3 : i32
    %11 = vector.broadcast %10 : i1 to vector<64x1xi1>
    %12 = vector.broadcast %11 : vector<64x1xi1> to vector<64x1xi1>
    %13 = arith.xori %9, %12 : vector<64x1xi1>
    %14 = arith.andi %13, %7 : vector<64x1xi1>
    %15 = vector.broadcast %3 : i32 to vector<64x1xi32>
    %16 = arith.addi %5, %15 : vector<64x1xi32>
    %17 = arith.select %14, %16, %5 : vector<64x1xi1>, vector<64x1xi32>
    %c0_i32_4 = arith.constant 0 : i32
    %18 = vector.broadcast %c0_i32_4 : i32 to vector<64x1xi32>
    %19 = arith.cmpi ne, %17, %18 : vector<64x1xi32>
    %20 = vector.shape_cast %19 : vector<64x1xi1> to vector<64x1xi1>
    %21 = vector.broadcast %20 : vector<64x1xi1> to vector<64x8xi1>
    %c31_i32 = arith.constant 31 : i32
    %22 = vector.broadcast %c31_i32 : i32 to vector<64x1xi32>
    %23 = arith.cmpi ne, %17, %22 : vector<64x1xi32>
    %24 = vector.shape_cast %23 : vector<64x1xi1> to vector<64x1xi1>
    %25 = vector.broadcast %24 : vector<64x1xi1> to vector<64x8xi1>
    %c0_5 = arith.constant 0 : index
    %c0_6 = arith.constant 0 : index
    %26 = vector.load %arg2[%c0_5, %c0_6] : memref<16x16xbf16, #tpu.memory_space<vmem>>, vector<16x16xbf16>
    %cst = arith.constant dense<0.000000e+00> : vector<64x16xf32>
    %27 = tpu.matmul %0, %26, %cst {dimension_numbers = #tpu.dot_dimension_numbers<[1], [0], [0], [1], [0, 0, 1, 1], [], []>} : vector<64x16xbf16>, vector<16x16xbf16>, vector<64x16xf32> -> vector<64x16xf32>
    %c0_7 = arith.constant 0 : index
    %c0_8 = arith.constant 0 : index
    %28 = vector.load %arg3[%c0_7, %c0_8] : memref<1x16xf32, #tpu.memory_space<vmem>>, vector<1x16xf32>
    %c0_9 = arith.constant 0 : index
    %c0_10 = arith.constant 0 : index
    %29 = vector.load %arg4[%c0_9, %c0_10] : memref<1x16xf32, #tpu.memory_space<vmem>>, vector<1x16xf32>
    %30 = vector.broadcast %28 : vector<1x16xf32> to vector<64x16xf32>
    %31 = arith.mulf %27, %30 : vector<64x16xf32>
    %32 = vector.broadcast %29 : vector<1x16xf32> to vector<64x16xf32>
    %33 = arith.addf %31, %32 : vector<64x16xf32>
    %34 = arith.negf %33 : vector<64x16xf32>
    %35 = math.exp %34 : vector<64x16xf32>
    %cst_11 = arith.constant 1.000000e+00 : f32
    %36 = vector.broadcast %cst_11 : f32 to vector<64x16xf32>
    %37 = arith.addf %36, %35 : vector<64x16xf32>
    %38 = arith.divf %36, %37 : vector<64x16xf32>
    %39 = arith.mulf %33, %38 : vector<64x16xf32>
    %40 = vector.extract_strided_slice %39 {offsets = [0, 8], sizes = [64, 8], strides = [1, 1]} : vector<64x16xf32> to vector<64x8xf32>
    %c0_12 = arith.constant 0 : index
    %c0_13 = arith.constant 0 : index
    %41 = vector.load %arg11[%c0_12, %c0_13] : memref<32x32xbf16, #tpu.memory_space<vmem>>, vector<32x32xbf16>
    %42 = arith.truncf %39 : vector<64x16xf32> to vector<64x16xbf16>
    %43 = vector.extract_strided_slice %41 {offsets = [0, 0], sizes = [16, 32], strides = [1, 1]} : vector<32x32xbf16> to vector<16x32xbf16>
    %cst_14 = arith.constant dense<0.000000e+00> : vector<64x32xf32>
    %44 = tpu.matmul %42, %43, %cst_14 {dimension_numbers = #tpu.dot_dimension_numbers<[1], [0], [0], [1], [0, 0, 1, 1], [], []>} : vector<64x16xbf16>, vector<16x32xbf16>, vector<64x32xf32> -> vector<64x32xf32>
    %c0_i32_15 = arith.constant 0 : i32
    %45 = arith.index_cast %c0_i32_15 : i32 to index
    %c0_16 = arith.constant 0 : index
    %c0_17 = arith.constant 0 : index
    %46 = vector.load %arg5[%45, %c0_16, %c0_17] : memref<2x24x8xbf16, #tpu.memory_space<vmem>>, vector<1x24x8xbf16>
    %47 = vector.shape_cast %46 : vector<1x24x8xbf16> to vector<24x8xbf16>
    %c1_i32_18 = arith.constant 1 : i32
    %48 = tpu.dynamic_rotate %40 by %c1_i32_18 dim 0 : vector<64x8xf32>, i32 -> vector<64x8xf32>
    %cst_19 = arith.constant 0.000000e+00 : f32
    %49 = vector.broadcast %cst_19 : f32 to vector<64x8xf32>
    %50 = arith.select %21, %48, %49 : vector<64x8xi1>, vector<64x8xf32>
    %c63_i32 = arith.constant 63 : i32
    %51 = tpu.dynamic_rotate %40 by %c63_i32 dim 0 : vector<64x8xf32>, i32 -> vector<64x8xf32>
    %cst_20 = arith.constant 0.000000e+00 : f32
    %52 = vector.broadcast %cst_20 : f32 to vector<64x8xf32>
    %53 = arith.select %25, %51, %52 : vector<64x8xi1>, vector<64x8xf32>
    %54 = arith.truncf %40 : vector<64x8xf32> to vector<64x8xbf16>
    %55 = vector.extract_strided_slice %47 {offsets = [8, 0], sizes = [8, 8], strides = [1, 1]} : vector<24x8xbf16> to vector<8x8xbf16>
    %cst_21 = arith.constant dense<0.000000e+00> : vector<64x8xf32>
    %56 = tpu.matmul %54, %55, %cst_21 {dimension_numbers = #tpu.dot_dimension_numbers<[1], [0], [0], [1], [0, 0, 1, 1], [], []>} : vector<64x8xbf16>, vector<8x8xbf16>, vector<64x8xf32> -> vector<64x8xf32>
    %57 = arith.truncf %50 : vector<64x8xf32> to vector<64x8xbf16>
    %58 = vector.extract_strided_slice %47 {offsets = [0, 0], sizes = [8, 8], strides = [1, 1]} : vector<24x8xbf16> to vector<8x8xbf16>
    %cst_22 = arith.constant dense<0.000000e+00> : vector<64x8xf32>
    %59 = tpu.matmul %57, %58, %cst_22 {dimension_numbers = #tpu.dot_dimension_numbers<[1], [0], [0], [1], [0, 0, 1, 1], [], []>} : vector<64x8xbf16>, vector<8x8xbf16>, vector<64x8xf32> -> vector<64x8xf32>
    %60 = arith.addf %56, %59 : vector<64x8xf32>
    %61 = arith.truncf %53 : vector<64x8xf32> to vector<64x8xbf16>
    %62 = vector.extract_strided_slice %47 {offsets = [16, 0], sizes = [8, 8], strides = [1, 1]} : vector<24x8xbf16> to vector<8x8xbf16>
    %cst_23 = arith.constant dense<0.000000e+00> : vector<64x8xf32>
    %63 = tpu.matmul %61, %62, %cst_23 {dimension_numbers = #tpu.dot_dimension_numbers<[1], [0], [0], [1], [0, 0, 1, 1], [], []>} : vector<64x8xbf16>, vector<8x8xbf16>, vector<64x8xf32> -> vector<64x8xf32>
    %64 = arith.addf %60, %63 : vector<64x8xf32>
    %65 = arith.index_cast %c0_i32_15 : i32 to index
    %c0_24 = arith.constant 0 : index
    %c0_25 = arith.constant 0 : index
    %66 = vector.load %arg6[%65, %c0_24, %c0_25] : memref<2x1x8xf32, #tpu.memory_space<vmem>>, vector<1x1x8xf32>
    %67 = vector.shape_cast %66 : vector<1x1x8xf32> to vector<1x8xf32>
    %68 = arith.index_cast %c0_i32_15 : i32 to index
    %c0_26 = arith.constant 0 : index
    %c0_27 = arith.constant 0 : index
    %69 = vector.load %arg7[%68, %c0_26, %c0_27] : memref<2x1x8xf32, #tpu.memory_space<vmem>>, vector<1x1x8xf32>
    %70 = vector.shape_cast %69 : vector<1x1x8xf32> to vector<1x8xf32>
    %71 = vector.broadcast %67 : vector<1x8xf32> to vector<64x8xf32>
    %72 = arith.mulf %64, %71 : vector<64x8xf32>
    %73 = vector.broadcast %70 : vector<1x8xf32> to vector<64x8xf32>
    %74 = arith.addf %72, %73 : vector<64x8xf32>
    %75 = arith.negf %74 : vector<64x8xf32>
    %76 = math.exp %75 : vector<64x8xf32>
    %cst_28 = arith.constant 1.000000e+00 : f32
    %77 = vector.broadcast %cst_28 : f32 to vector<64x8xf32>
    %78 = arith.addf %77, %76 : vector<64x8xf32>
    %79 = arith.divf %77, %78 : vector<64x8xf32>
    %80 = arith.mulf %74, %79 : vector<64x8xf32>
    %c1_i32_29 = arith.constant 1 : i32
    %81 = arith.index_cast %c1_i32_29 : i32 to index
    %c0_30 = arith.constant 0 : index
    %c0_31 = arith.constant 0 : index
    %82 = vector.load %arg5[%81, %c0_30, %c0_31] : memref<2x24x8xbf16, #tpu.memory_space<vmem>>, vector<1x24x8xbf16>
    %83 = vector.shape_cast %82 : vector<1x24x8xbf16> to vector<24x8xbf16>
    %c1_i32_32 = arith.constant 1 : i32
    %84 = tpu.dynamic_rotate %80 by %c1_i32_32 dim 0 : vector<64x8xf32>, i32 -> vector<64x8xf32>
    %cst_33 = arith.constant 0.000000e+00 : f32
    %85 = vector.broadcast %cst_33 : f32 to vector<64x8xf32>
    %86 = arith.select %21, %84, %85 : vector<64x8xi1>, vector<64x8xf32>
    %c63_i32_34 = arith.constant 63 : i32
    %87 = tpu.dynamic_rotate %80 by %c63_i32_34 dim 0 : vector<64x8xf32>, i32 -> vector<64x8xf32>
    %cst_35 = arith.constant 0.000000e+00 : f32
    %88 = vector.broadcast %cst_35 : f32 to vector<64x8xf32>
    %89 = arith.select %25, %87, %88 : vector<64x8xi1>, vector<64x8xf32>
    %90 = arith.truncf %80 : vector<64x8xf32> to vector<64x8xbf16>
    %91 = vector.extract_strided_slice %83 {offsets = [8, 0], sizes = [8, 8], strides = [1, 1]} : vector<24x8xbf16> to vector<8x8xbf16>
    %cst_36 = arith.constant dense<0.000000e+00> : vector<64x8xf32>
    %92 = tpu.matmul %90, %91, %cst_36 {dimension_numbers = #tpu.dot_dimension_numbers<[1], [0], [0], [1], [0, 0, 1, 1], [], []>} : vector<64x8xbf16>, vector<8x8xbf16>, vector<64x8xf32> -> vector<64x8xf32>
    %93 = arith.truncf %86 : vector<64x8xf32> to vector<64x8xbf16>
    %94 = vector.extract_strided_slice %83 {offsets = [0, 0], sizes = [8, 8], strides = [1, 1]} : vector<24x8xbf16> to vector<8x8xbf16>
    %cst_37 = arith.constant dense<0.000000e+00> : vector<64x8xf32>
    %95 = tpu.matmul %93, %94, %cst_37 {dimension_numbers = #tpu.dot_dimension_numbers<[1], [0], [0], [1], [0, 0, 1, 1], [], []>} : vector<64x8xbf16>, vector<8x8xbf16>, vector<64x8xf32> -> vector<64x8xf32>
    %96 = arith.addf %92, %95 : vector<64x8xf32>
    %97 = arith.truncf %89 : vector<64x8xf32> to vector<64x8xbf16>
    %98 = vector.extract_strided_slice %83 {offsets = [16, 0], sizes = [8, 8], strides = [1, 1]} : vector<24x8xbf16> to vector<8x8xbf16>
    %cst_38 = arith.constant dense<0.000000e+00> : vector<64x8xf32>
    %99 = tpu.matmul %97, %98, %cst_38 {dimension_numbers = #tpu.dot_dimension_numbers<[1], [0], [0], [1], [0, 0, 1, 1], [], []>} : vector<64x8xbf16>, vector<8x8xbf16>, vector<64x8xf32> -> vector<64x8xf32>
    %100 = arith.addf %96, %99 : vector<64x8xf32>
    %101 = arith.index_cast %c1_i32_29 : i32 to index
    %c0_39 = arith.constant 0 : index
    %c0_40 = arith.constant 0 : index
    %102 = vector.load %arg6[%101, %c0_39, %c0_40] : memref<2x1x8xf32, #tpu.memory_space<vmem>>, vector<1x1x8xf32>
    %103 = vector.shape_cast %102 : vector<1x1x8xf32> to vector<1x8xf32>
    %104 = arith.index_cast %c1_i32_29 : i32 to index
    %c0_41 = arith.constant 0 : index
    %c0_42 = arith.constant 0 : index
    %105 = vector.load %arg7[%104, %c0_41, %c0_42] : memref<2x1x8xf32, #tpu.memory_space<vmem>>, vector<1x1x8xf32>
    %106 = vector.shape_cast %105 : vector<1x1x8xf32> to vector<1x8xf32>
    %107 = vector.broadcast %103 : vector<1x8xf32> to vector<64x8xf32>
    %108 = arith.mulf %100, %107 : vector<64x8xf32>
    %109 = vector.broadcast %106 : vector<1x8xf32> to vector<64x8xf32>
    %110 = arith.addf %108, %109 : vector<64x8xf32>
    %111 = arith.negf %110 : vector<64x8xf32>
    %112 = math.exp %111 : vector<64x8xf32>
    %cst_43 = arith.constant 1.000000e+00 : f32
    %113 = vector.broadcast %cst_43 : f32 to vector<64x8xf32>
    %114 = arith.addf %113, %112 : vector<64x8xf32>
    %115 = arith.divf %113, %114 : vector<64x8xf32>
    %116 = arith.mulf %110, %115 : vector<64x8xf32>
    %c2_i32 = arith.constant 2 : i32
    %117 = arith.truncf %116 : vector<64x8xf32> to vector<64x8xbf16>
    %118 = vector.extract_strided_slice %41 {offsets = [16, 0], sizes = [8, 32], strides = [1, 1]} : vector<32x32xbf16> to vector<8x32xbf16>
    %cst_44 = arith.constant dense<0.000000e+00> : vector<64x32xf32>
    %119 = tpu.matmul %117, %118, %cst_44 {dimension_numbers = #tpu.dot_dimension_numbers<[1], [0], [0], [1], [0, 0, 1, 1], [], []>} : vector<64x8xbf16>, vector<8x32xbf16>, vector<64x32xf32> -> vector<64x32xf32>
    %120 = arith.addf %44, %119 : vector<64x32xf32>
    %c0_i32_45 = arith.constant 0 : i32
    %121 = arith.index_cast %c0_i32_45 : i32 to index
    %c0_46 = arith.constant 0 : index
    %c0_47 = arith.constant 0 : index
    %122 = vector.load %arg8[%121, %c0_46, %c0_47] : memref<2x24x8xbf16, #tpu.memory_space<vmem>>, vector<1x24x8xbf16>
    %123 = vector.shape_cast %122 : vector<1x24x8xbf16> to vector<24x8xbf16>
    %c1_i32_48 = arith.constant 1 : i32
    %124 = tpu.dynamic_rotate %116 by %c1_i32_48 dim 0 : vector<64x8xf32>, i32 -> vector<64x8xf32>
    %cst_49 = arith.constant 0.000000e+00 : f32
    %125 = vector.broadcast %cst_49 : f32 to vector<64x8xf32>
    %126 = arith.select %21, %124, %125 : vector<64x8xi1>, vector<64x8xf32>
    %c63_i32_50 = arith.constant 63 : i32
    %127 = tpu.dynamic_rotate %116 by %c63_i32_50 dim 0 : vector<64x8xf32>, i32 -> vector<64x8xf32>
    %cst_51 = arith.constant 0.000000e+00 : f32
    %128 = vector.broadcast %cst_51 : f32 to vector<64x8xf32>
    %129 = arith.select %25, %127, %128 : vector<64x8xi1>, vector<64x8xf32>
    %130 = arith.truncf %116 : vector<64x8xf32> to vector<64x8xbf16>
    %131 = vector.extract_strided_slice %123 {offsets = [8, 0], sizes = [8, 8], strides = [1, 1]} : vector<24x8xbf16> to vector<8x8xbf16>
    %cst_52 = arith.constant dense<0.000000e+00> : vector<64x8xf32>
    %132 = tpu.matmul %130, %131, %cst_52 {dimension_numbers = #tpu.dot_dimension_numbers<[1], [0], [0], [1], [0, 0, 1, 1], [], []>} : vector<64x8xbf16>, vector<8x8xbf16>, vector<64x8xf32> -> vector<64x8xf32>
    %133 = arith.truncf %126 : vector<64x8xf32> to vector<64x8xbf16>
    %134 = vector.extract_strided_slice %123 {offsets = [0, 0], sizes = [8, 8], strides = [1, 1]} : vector<24x8xbf16> to vector<8x8xbf16>
    %cst_53 = arith.constant dense<0.000000e+00> : vector<64x8xf32>
    %135 = tpu.matmul %133, %134, %cst_53 {dimension_numbers = #tpu.dot_dimension_numbers<[1], [0], [0], [1], [0, 0, 1, 1], [], []>} : vector<64x8xbf16>, vector<8x8xbf16>, vector<64x8xf32> -> vector<64x8xf32>
    %136 = arith.addf %132, %135 : vector<64x8xf32>
    %137 = arith.truncf %129 : vector<64x8xf32> to vector<64x8xbf16>
    %138 = vector.extract_strided_slice %123 {offsets = [16, 0], sizes = [8, 8], strides = [1, 1]} : vector<24x8xbf16> to vector<8x8xbf16>
    %cst_54 = arith.constant dense<0.000000e+00> : vector<64x8xf32>
    %139 = tpu.matmul %137, %138, %cst_54 {dimension_numbers = #tpu.dot_dimension_numbers<[1], [0], [0], [1], [0, 0, 1, 1], [], []>} : vector<64x8xbf16>, vector<8x8xbf16>, vector<64x8xf32> -> vector<64x8xf32>
    %140 = arith.addf %136, %139 : vector<64x8xf32>
    %141 = arith.index_cast %c0_i32_45 : i32 to index
    %c0_55 = arith.constant 0 : index
    %c0_56 = arith.constant 0 : index
    %142 = vector.load %arg9[%141, %c0_55, %c0_56] : memref<2x1x8xf32, #tpu.memory_space<vmem>>, vector<1x1x8xf32>
    %143 = vector.shape_cast %142 : vector<1x1x8xf32> to vector<1x8xf32>
    %144 = arith.index_cast %c0_i32_45 : i32 to index
    %c0_57 = arith.constant 0 : index
    %c0_58 = arith.constant 0 : index
    %145 = vector.load %arg10[%144, %c0_57, %c0_58] : memref<2x1x8xf32, #tpu.memory_space<vmem>>, vector<1x1x8xf32>
    %146 = vector.shape_cast %145 : vector<1x1x8xf32> to vector<1x8xf32>
    %147 = vector.broadcast %143 : vector<1x8xf32> to vector<64x8xf32>
    %148 = arith.mulf %140, %147 : vector<64x8xf32>
    %149 = vector.broadcast %146 : vector<1x8xf32> to vector<64x8xf32>
    %150 = arith.addf %148, %149 : vector<64x8xf32>
    %151 = arith.negf %150 : vector<64x8xf32>
    %152 = math.exp %151 : vector<64x8xf32>
    %cst_59 = arith.constant 1.000000e+00 : f32
    %153 = vector.broadcast %cst_59 : f32 to vector<64x8xf32>
    %154 = arith.addf %153, %152 : vector<64x8xf32>
    %155 = arith.divf %153, %154 : vector<64x8xf32>
    %156 = arith.mulf %150, %155 : vector<64x8xf32>
    %c1_i32_60 = arith.constant 1 : i32
    %157 = arith.index_cast %c1_i32_60 : i32 to index
    %c0_61 = arith.constant 0 : index
    %c0_62 = arith.constant 0 : index
    %158 = vector.load %arg8[%157, %c0_61, %c0_62] : memref<2x24x8xbf16, #tpu.memory_space<vmem>>, vector<1x24x8xbf16>
    %159 = vector.shape_cast %158 : vector<1x24x8xbf16> to vector<24x8xbf16>
    %c1_i32_63 = arith.constant 1 : i32
    %160 = tpu.dynamic_rotate %156 by %c1_i32_63 dim 0 : vector<64x8xf32>, i32 -> vector<64x8xf32>
    %cst_64 = arith.constant 0.000000e+00 : f32
    %161 = vector.broadcast %cst_64 : f32 to vector<64x8xf32>
    %162 = arith.select %21, %160, %161 : vector<64x8xi1>, vector<64x8xf32>
    %c63_i32_65 = arith.constant 63 : i32
    %163 = tpu.dynamic_rotate %156 by %c63_i32_65 dim 0 : vector<64x8xf32>, i32 -> vector<64x8xf32>
    %cst_66 = arith.constant 0.000000e+00 : f32
    %164 = vector.broadcast %cst_66 : f32 to vector<64x8xf32>
    %165 = arith.select %25, %163, %164 : vector<64x8xi1>, vector<64x8xf32>
    %166 = arith.truncf %156 : vector<64x8xf32> to vector<64x8xbf16>
    %167 = vector.extract_strided_slice %159 {offsets = [8, 0], sizes = [8, 8], strides = [1, 1]} : vector<24x8xbf16> to vector<8x8xbf16>
    %cst_67 = arith.constant dense<0.000000e+00> : vector<64x8xf32>
    %168 = tpu.matmul %166, %167, %cst_67 {dimension_numbers = #tpu.dot_dimension_numbers<[1], [0], [0], [1], [0, 0, 1, 1], [], []>} : vector<64x8xbf16>, vector<8x8xbf16>, vector<64x8xf32> -> vector<64x8xf32>
    %169 = arith.truncf %162 : vector<64x8xf32> to vector<64x8xbf16>
    %170 = vector.extract_strided_slice %159 {offsets = [0, 0], sizes = [8, 8], strides = [1, 1]} : vector<24x8xbf16> to vector<8x8xbf16>
    %cst_68 = arith.constant dense<0.000000e+00> : vector<64x8xf32>
    %171 = tpu.matmul %169, %170, %cst_68 {dimension_numbers = #tpu.dot_dimension_numbers<[1], [0], [0], [1], [0, 0, 1, 1], [], []>} : vector<64x8xbf16>, vector<8x8xbf16>, vector<64x8xf32> -> vector<64x8xf32>
    %172 = arith.addf %168, %171 : vector<64x8xf32>
    %173 = arith.truncf %165 : vector<64x8xf32> to vector<64x8xbf16>
    %174 = vector.extract_strided_slice %159 {offsets = [16, 0], sizes = [8, 8], strides = [1, 1]} : vector<24x8xbf16> to vector<8x8xbf16>
    %cst_69 = arith.constant dense<0.000000e+00> : vector<64x8xf32>
    %175 = tpu.matmul %173, %174, %cst_69 {dimension_numbers = #tpu.dot_dimension_numbers<[1], [0], [0], [1], [0, 0, 1, 1], [], []>} : vector<64x8xbf16>, vector<8x8xbf16>, vector<64x8xf32> -> vector<64x8xf32>
    %176 = arith.addf %172, %175 : vector<64x8xf32>
    %177 = arith.index_cast %c1_i32_60 : i32 to index
    %c0_70 = arith.constant 0 : index
    %c0_71 = arith.constant 0 : index
    %178 = vector.load %arg9[%177, %c0_70, %c0_71] : memref<2x1x8xf32, #tpu.memory_space<vmem>>, vector<1x1x8xf32>
    %179 = vector.shape_cast %178 : vector<1x1x8xf32> to vector<1x8xf32>
    %180 = arith.index_cast %c1_i32_60 : i32 to index
    %c0_72 = arith.constant 0 : index
    %c0_73 = arith.constant 0 : index
    %181 = vector.load %arg10[%180, %c0_72, %c0_73] : memref<2x1x8xf32, #tpu.memory_space<vmem>>, vector<1x1x8xf32>
    %182 = vector.shape_cast %181 : vector<1x1x8xf32> to vector<1x8xf32>
    %183 = vector.broadcast %179 : vector<1x8xf32> to vector<64x8xf32>
    %184 = arith.mulf %176, %183 : vector<64x8xf32>
    %185 = vector.broadcast %182 : vector<1x8xf32> to vector<64x8xf32>
    %186 = arith.addf %184, %185 : vector<64x8xf32>
    %187 = arith.negf %186 : vector<64x8xf32>
    %188 = math.exp %187 : vector<64x8xf32>
    %cst_74 = arith.constant 1.000000e+00 : f32
    %189 = vector.broadcast %cst_74 : f32 to vector<64x8xf32>
    %190 = arith.addf %189, %188 : vector<64x8xf32>
    %191 = arith.divf %189, %190 : vector<64x8xf32>
    %192 = arith.mulf %186, %191 : vector<64x8xf32>
    %c2_i32_75 = arith.constant 2 : i32
    %193 = arith.truncf %192 : vector<64x8xf32> to vector<64x8xbf16>
    %194 = vector.extract_strided_slice %41 {offsets = [24, 0], sizes = [8, 32], strides = [1, 1]} : vector<32x32xbf16> to vector<8x32xbf16>
    %cst_76 = arith.constant dense<0.000000e+00> : vector<64x32xf32>
    %195 = tpu.matmul %193, %194, %cst_76 {dimension_numbers = #tpu.dot_dimension_numbers<[1], [0], [0], [1], [0, 0, 1, 1], [], []>} : vector<64x8xbf16>, vector<8x32xbf16>, vector<64x32xf32> -> vector<64x32xf32>
    %196 = arith.addf %120, %195 : vector<64x32xf32>
    %c0_77 = arith.constant 0 : index
    %c0_78 = arith.constant 0 : index
    %197 = vector.load %arg12[%c0_77, %c0_78] : memref<1x32xf32, #tpu.memory_space<vmem>>, vector<1x32xf32>
    %c0_79 = arith.constant 0 : index
    %c0_80 = arith.constant 0 : index
    %198 = vector.load %arg13[%c0_79, %c0_80] : memref<1x32xf32, #tpu.memory_space<vmem>>, vector<1x32xf32>
    %199 = vector.broadcast %197 : vector<1x32xf32> to vector<64x32xf32>
    %200 = arith.mulf %196, %199 : vector<64x32xf32>
    %201 = vector.broadcast %198 : vector<1x32xf32> to vector<64x32xf32>
    %202 = arith.addf %200, %201 : vector<64x32xf32>
    %203 = arith.negf %202 : vector<64x32xf32>
    %204 = math.exp %203 : vector<64x32xf32>
    %cst_81 = arith.constant 1.000000e+00 : f32
    %205 = vector.broadcast %cst_81 : f32 to vector<64x32xf32>
    %206 = arith.addf %205, %204 : vector<64x32xf32>
    %207 = arith.divf %205, %206 : vector<64x32xf32>
    %208 = arith.mulf %202, %207 : vector<64x32xf32>
    %c0_82 = arith.constant 0 : index
    %c0_83 = arith.constant 0 : index
    %209 = vector.load %arg14[%c0_82, %c0_83] : memref<64x32xf32, #tpu.memory_space<vmem>>, vector<64x32xf32>
    tpu.vector_store %arg14[%c0_82, %c0_83], %208 {strides = array<i32>} : memref<64x32xf32, #tpu.memory_space<vmem>>, vector<64x32xf32>,
    return
  }
  func.func @transform_0(%arg0: i32) -> (i32, i32) {
    %c0_i32 = arith.constant 0 : i32
    %c0_i32_0 = arith.constant 0 : i32
    return %arg0, %c0_i32 : i32, i32
  }
  func.func @transform_1(%arg0: i32) -> (i32, i32) {
    %c0_i32 = arith.constant 0 : i32
    %c0_i32_0 = arith.constant 0 : i32
    %c0_i32_1 = arith.constant 0 : i32
    return %c0_i32, %c0_i32_0 : i32, i32
  }
  func.func @transform_2(%arg0: i32) -> (i32, i32) {
    %c0_i32 = arith.constant 0 : i32
    %c0_i32_0 = arith.constant 0 : i32
    %c0_i32_1 = arith.constant 0 : i32
    return %c0_i32, %c0_i32_0 : i32, i32
  }
  func.func @transform_3(%arg0: i32) -> (i32, i32) {
    %c0_i32 = arith.constant 0 : i32
    %c0_i32_0 = arith.constant 0 : i32
    %c0_i32_1 = arith.constant 0 : i32
    return %c0_i32, %c0_i32_0 : i32, i32
  }
  func.func @transform_4(%arg0: i32) -> (i32, i32, i32) {
    %c0_i32 = arith.constant 0 : i32
    %c0_i32_0 = arith.constant 0 : i32
    %c0_i32_1 = arith.constant 0 : i32
    %c0_i32_2 = arith.constant 0 : i32
    return %c0_i32, %c0_i32_0, %c0_i32_1 : i32, i32, i32
  }
  func.func @transform_5(%arg0: i32) -> (i32, i32, i32) {
    %c0_i32 = arith.constant 0 : i32
    %c0_i32_0 = arith.constant 0 : i32
    %c0_i32_1 = arith.constant 0 : i32
    %c0_i32_2 = arith.constant 0 : i32
    return %c0_i32, %c0_i32_0, %c0_i32_1 : i32, i32, i32
  }
  func.func @transform_6(%arg0: i32) -> (i32, i32, i32) {
    %c0_i32 = arith.constant 0 : i32
    %c0_i32_0 = arith.constant 0 : i32
    %c0_i32_1 = arith.constant 0 : i32
    %c0_i32_2 = arith.constant 0 : i32
    return %c0_i32, %c0_i32_0, %c0_i32_1 : i32, i32, i32
  }
  func.func @transform_7(%arg0: i32) -> (i32, i32, i32) {
    %c0_i32 = arith.constant 0 : i32
    %c0_i32_0 = arith.constant 0 : i32
    %c0_i32_1 = arith.constant 0 : i32
    %c0_i32_2 = arith.constant 0 : i32
    return %c0_i32, %c0_i32_0, %c0_i32_1 : i32, i32, i32
  }
  func.func @transform_8(%arg0: i32) -> (i32, i32, i32) {
    %c0_i32 = arith.constant 0 : i32
    %c0_i32_0 = arith.constant 0 : i32
    %c0_i32_1 = arith.constant 0 : i32
    %c0_i32_2 = arith.constant 0 : i32
    return %c0_i32, %c0_i32_0, %c0_i32_1 : i32, i32, i32
  }
  func.func @transform_9(%arg0: i32) -> (i32, i32, i32) {
    %c0_i32 = arith.constant 0 : i32
    %c0_i32_0 = arith.constant 0 : i32
    %c0_i32_1 = arith.constant 0 : i32
    %c0_i32_2 = arith.constant 0 : i32
    return %c0_i32, %c0_i32_0, %c0_i32_1 : i32, i32, i32
  }
  func.func @transform_10(%arg0: i32) -> (i32, i32) {
    %c0_i32 = arith.constant 0 : i32
    %c0_i32_0 = arith.constant 0 : i32
    %c0_i32_1 = arith.constant 0 : i32
    return %c0_i32, %c0_i32_0 : i32, i32
  }
  func.func @transform_11(%arg0: i32) -> (i32, i32) {
    %c0_i32 = arith.constant 0 : i32
    %c0_i32_0 = arith.constant 0 : i32
    %c0_i32_1 = arith.constant 0 : i32
    return %c0_i32, %c0_i32_0 : i32, i32
  }
  func.func @transform_12(%arg0: i32) -> (i32, i32) {
    %c0_i32 = arith.constant 0 : i32
    %c0_i32_0 = arith.constant 0 : i32
    %c0_i32_1 = arith.constant 0 : i32
    return %c0_i32, %c0_i32_0 : i32, i32
  }
  func.func @transform_13(%arg0: i32) -> (i32, i32) {
    %c0_i32 = arith.constant 0 : i32
    %c0_i32_0 = arith.constant 0 : i32
    return %arg0, %c0_i32 : i32, i32
  }
}

</mosaic_0001>

<bundles_post_ra>
// kernel: tpu_custom_call.1
= control target key start
LH: loop header
LB: loop body
LE: loop exit
PB: predicated region body
PF: predicated region fallthrough
CT: control target
= control target key end

     0   :  { %s3629_s25 = smov 0   ;;  %s4225_s0 = inlined_call_operand.vmem [shape: bf16[128,16], index: 0, kind: input, shape index: {}]   ;;  %s4226_s1 = inlined_call_operand.vmem [shape: bf16[16,16], index: 1, kind: input, shape index: {}]   ;;  %s4227_s2 = inlined_call_operand.vmem [shape: f32[1,16], index: 2, kind: input, shape index: {}]   ;;  %s4228_s3 = inlined_call_operand.vmem [shape: f32[1,16], index: 3, kind: input, shape index: {}]   ;;  %s4229_s4 = inlined_call_operand.vmem [shape: bf16[2,24,8], index: 4, kind: input, shape index: {}]   ;;  %s4230_s5 = inlined_call_operand.vmem [shape: f32[2,1,8], index: 5, kind: input, shape index: {}]   ;;  %s4231_s6 = inlined_call_operand.vmem [shape: f32[2,1,8], index: 6, kind: input, shape index: {}]   ;;  %s4232_s7 = inlined_call_operand.vmem [shape: bf16[2,24,8], index: 7, kind: input, shape index: {}]   ;;  %s4233_s8 = inlined_call_operand.vmem [shape: f32[2,1,8], index: 8, kind: input, shape index: {}]   ;;  %s4234_s9 = inlined_call_operand.vmem [shape: f32[2,1,8], index: 9, kind: input, shape index: {}]   ;;  %s4235_s10 = inlined_call_operand.vmem [shape: bf16[32,32], index: 10, kind: input, shape index: {}]   ;;  %s4236_s11 = inlined_call_operand.vmem [shape: f32[1,32], index: 11, kind: input, shape index: {}]   ;;  %s4237_s12 = inlined_call_operand.vmem [shape: f32[1,32], index: 12, kind: input, shape index: {}]   ;;  %s4238_s13 = inlined_call_operand.vmem [shape: f32[128,32], index: 13, kind: output, shape index: {}]  }
   0x1 LB: > { %s2838_s26 = sadd.s32 4294967295, %s3556_s25   ;;  %p2842_p0 = scmp.ge.s32.totalorder %s3556_s25, 1  ;;  %s3556_s25 = sphi %s3629_s25, %s23_s25  }
   0x2   : > { %p388_p1 = scmp.lt.s32.totalorder %s3556_s25, 3 }
   0x4   : > { %p389_p2 = pnand %p2842_p0, %p388_p1 }
   0x5   : > { %v3352_v0 = vld [vmem:[%s4226_s1] sm:$0xff] (!%p389_p2)   ;;  %s2843_s29 = sshll.u32 (!%p389_p2), %s2838_s26, 3  ;;  %vm634_vm0 = vcmask (!%p389_p2), 130048   ;;  %vm908_vm1 = vcmask (!%p389_p2), 1043456   ;;  %v808_v58 = vld [vmem:[%s4229_s4 + $0x8] sm:$0xf] (!%p389_p2) }
   0x6   : > { %392 = sbr.rel (%p389_p2) target bundleno = 1794 (0x702), region = 72  ;;  %p433_p3 = scmp.lt.s32.totalorder (!%p389_p2), %s2843_s29, 15  ;;  %3069 = vmatprep.subr.bf16.mxu0 (!%p389_p2), %v3352_v0  ;;  %v2856_v5 = vld [vmem:[%s4227_s2] ss:$0 sm:$0xff] (!%p389_p2)  ;;  %v807_v47 = vld [vmem:[%s4229_s4 + $0x4] sm:$0xf] (!%p389_p2) }
   0x7   : > { %3070 = vmatpush3.bf16.msra.mxu0 (!%p389_p2), %v3352_v0  ;;  %v2857_v7 = vld [vmem:[%s4228_s3] ss:$0 sm:$0xff] (!%p389_p2)  ;;  %3310 = vmatprep.subr.msk.bf16.mxu1 (!%p389_p2), %vm908_vm1, %v807_v47  ;;  %v1002_v49 = vsel (!%p389_p2), %vm908_vm1, %v807_v47, 0  ;;  %s3558_s28 = smov (!%p389_p2), 120   ;;  %vm895_vm2 = vcmask (!%p389_p2), 64512   ;;  %vm2773_vm9 = vcmask (!%p389_p2), 261120  }
   0x8   : > { %3090 = vmatpush3.bf16.msra.mxu1 (!%p389_p2), %v1002_v49  ;;  %v806_v57 = vld [vmem:[%s4229_s4] sm:$0xf] (!%p389_p2) }
   0x9   : > { %3309 = vmatprep.subr.msk.bf16.mxu0 (!%p389_p2), %vm908_vm1, %v806_v57  ;;  %3311 = vmatprep.subr.msk.bf16.mxu1 (!%p389_p2), %vm908_vm1, %v808_v58  ;;  %v910_v61 = vsel (!%p389_p2), %vm908_vm1, %v806_v57, 0 }
   0xd   : > { %s4248_s29 = smov (!%p433_p3, %s2843_s29), 15 }
   0xe   : > { %s2844_s30 = sshll.u32 %s4248_s29, 2 }
   0xf   : > { %s436_s16 = scalar_lea.vmem %s4225_s0, %s2844_s30 }
  0x10   : > { %v3353_v1 = vld [vmem:[%s436_s16] sm:$0xff]   ;;  %v3354_v2 = vld [vmem:[%s436_s16 + $0x8] sm:$0xff]   ;;  %v3355_v3 = vld [vmem:[%s436_s16 + $0x10] sm:$0xff]  }
  0x11   : > { %3071 = vmatprep.mubr.msk.bf16.mxu0 %vm634_vm0, %v3353_v1  ;;  %v3356_v4 = vld [vmem:[%s436_s16 + $0x18] sm:$0xff]  }
  0x12   : > { %3072 = vmatmul.mubr.msk.bf16.vlgmr.msra.gmra.mrb[0].mxu0 %vm634_vm0, %v3354_v2 }
  0x13   : > { %3075 = vmatprep.mubr.msk.bf16.mxu0 %vm634_vm0, %v3355_v3  ;;  %3080 = vmatpush3.bf16.msra.mxu0 %v910_v61 }
  0x1a   : > { %3076 = vmatmul.mubr.msk.bf16.gmra.mrb[4].mxu0 %vm634_vm0, %v3356_v4 }
  0xe5   : > { %v3073_v6 = vpop.f32.mrb[0].mxu0 }
  0xe6   : > { %v722_v8 = vmul.f32 %v3073_v6, %v2856_v5  ;;  %v681_v9 = vpop.f32.mrb[1].mxu0 }
  0xe7   : > { %v720_v10 = vmul.f32 %v2856_v5, %v681_v9  ;;  %v3074_v11 = vpop.f32.mrb[2].mxu0 }
  0xe8   : > { %v3656_v12 = vadd.f32 %v2857_v7, %v722_v8  ;;  %v723_v13 = vmul.f32 %v3074_v11, %v2856_v5  ;;  %v684_v14 = vpop.f32.mrb[3].mxu0 }
  0xe9   : > { %v3658_v15 = vadd.f32 %v2857_v7, %v720_v10  ;;  %v721_v16 = vmul.f32 %v2856_v5, %v684_v14 }
  0xea   : > { %v2860_v17 = vmul.f32 -1.442695, %v3656_v12  ;;  %v3661_v18 = vadd.f32 %v2857_v7, %v723_v13 }
  0xeb   : > { %v2858_v19 = vmul.f32 -1.442695, %v3658_v15  ;;  %v3664_v20 = vadd.f32 %v2857_v7, %v721_v16 }
  0xec   : > { %3358 = vpow2.f32 %v2860_v17  ;;  %v2861_v21 = vmul.f32 -1.442695, %v3661_v18 }
  0xed   : > { %3360 = vpow2.f32 %v2858_v19  ;;  %v2859_v22 = vmul.f32 -1.442695, %v3664_v20  ;;  %v3077_v23 = vpop.f32.mrb[4].mxu0 }
  0xee   : > { %3362 = vpow2.f32 %v2861_v21  ;;  %v726_v24 = vmul.f32 %v3077_v23, %v2856_v5  ;;  %v697_v25 = vpop.f32.mrb[5].mxu0  ;;  %v1086_v21 = vsel %vm908_vm1, %v808_v58, 0 }
  0xef   : > { %3364 = vpow2.f32 %v2859_v22  ;;  %v724_v26 = vmul.f32 %v2856_v5, %v697_v25  ;;  %v3078_v27 = vpop.f32.mrb[6].mxu0  ;;  %v453_v22 = vlaneseq }
  0xf0   : > { %v3668_v28 = vadd.f32 %v2857_v7, %v726_v24  ;;  %v727_v29 = vmul.f32 %v3078_v27, %v2856_v5  ;;  %v700_v30 = vpop.f32.mrb[7].mxu0 }
  0xf1   : > { %v3670_v31 = vadd.f32 %v2857_v7, %v724_v26  ;;  %v725_v32 = vmul.f32 %v2856_v5, %v700_v30  ;;  %v3713_v25 = vshrl.u32 %v453_v22, 7 }
  0xf2   : > { %v2864_v33 = vmul.f32 -1.442695, %v3668_v28  ;;  %v3673_v34 = vadd.f32 %v2857_v7, %v727_v29 }
  0xf3   : > { %v2862_v35 = vmul.f32 -1.442695, %v3670_v31  ;;  %v739_v36 = vadd.f32 %v2857_v7, %v725_v32  ;;  %v457_v29 = vadd.s32 24, %v3713_v25  ;;  %v458_v30 = vadd.s32 32, %v3713_v25 }
  0xf4   : > { %3366 = vpow2.f32 %v2864_v33  ;;  %v2865_v37 = vmul.f32 -1.442695, %v3673_v34  ;;  %vm849_vm3 = vcmp.lt.s32.totalorder %v3713_v25, 1  ;;  %vm874_vm5 = vcmp.lt.s32.totalorder %v3713_v25, 7 }
  0xf5   : > { %3368 = vpow2.f32 %v2862_v35  ;;  %v2863_v38 = vmul.f32 -1.442695, %v739_v36  ;;  %v466_v35 = vand.u32 31, %v3713_v25 }
  0xf6   : > { %v3359_v39 = vpop.eup %3358  ;;  %3370 = vpow2.f32 %v2865_v37  ;;  %v494_v37 = vand.u32 31, %v458_v30  ;;  %v801_v30 = vld [vmem:[%s4235_s10 + $0xc] sm:$0xf] }
  0xf7   : > { %v3361_v40 = vpop.eup %3360  ;;  %v768_v41 = vadd.f32 1.0, %v3359_v39  ;;  %3372 = vpow2.f32 %v2863_v38  ;;  %vm3726_vm4 = vcmp.ne.s32.totalorder %v466_v35, 0 }
  0xf8   : > { %v3363_v42 = vpop.eup %3362  ;;  %v766_v43 = vadd.f32 1.0, %v3361_v40  ;;  %vm3731_vm6 = vcmp.ne.s32.totalorder %v494_v37, 0  ;;  %v3799_v37 = vld [vmem:[%s4229_s4 + $0x10] sm:$0xf] }
  0xf9   : > { %v3365_v44 = vpop.eup %3364  ;;  %3374 = vrcp.f32 %v768_v41  ;;  %v769_v45 = vadd.f32 1.0, %v3363_v42 }
  0xfa   : > { %3376 = vrcp.f32 %v766_v43  ;;  %v767_v46 = vadd.f32 1.0, %v3365_v44 }
  0xfb   : > { %3378 = vrcp.f32 %v769_v45 }
  0xfc   : > { %3380 = vrcp.f32 %v767_v46 }
  0xfe   : > { %v3367_v48 = vpop.eup %3366 }
  0xff   : > { %v3369_v50 = vpop.eup %3368  ;;  %v772_v51 = vadd.f32 1.0, %v3367_v48 }
 0x100   : > { %v3371_v52 = vpop.eup %3370  ;;  %v770_v53 = vadd.f32 1.0, %v3369_v50 }
 0x101   : > { %v3373_v54 = vpop.eup %3372  ;;  %3382 = vrcp.f32 %v772_v51  ;;  %v773_v55 = vadd.f32 1.0, %v3371_v52  ;;  %v461_v51 = vadd.s32 56, %v3713_v25 }
 0x102   : > { %3384 = vrcp.f32 %v770_v53  ;;  %v771_v56 = vadd.f32 1.0, %v3373_v54 }
 0x103   : > { %v3375_v59 = vpop.eup %3374  ;;  %3386 = vrcp.f32 %v773_v55 }
 0x104   : > { %v3377_v60 = vpop.eup %3376  ;;  %3388 = vrcp.f32 %v771_v56  ;;  %v792_v0 = vmul.f32 %v3375_v59, %v3656_v12 }
 0x105   : > { %v3379_v62 = vpop.eup %3378  ;;  %v790_v2 = vmul.f32 %v3377_v60, %v3658_v15 }
 0x106   : > { %v3381_v63 = vpop.eup %3380  ;;  %v793_v1 = vmul.f32 %v3379_v62, %v3661_v18 }
 0x107   : > { %v791_v3 = vmul.f32 %v3381_v63, %v3664_v20 }
 0x108   : > { %v3695_v4 = vpack.c.bf16 %v793_v1, %v792_v0 }
 0x109   : > { %v3697_v5 = vpack.c.bf16 %v791_v3, %v790_v2  ;;  %v3337_v6 = vpack.i.bf16 %v792_v0, %v791_v3 }
 0x10b   : > { %v3383_v7 = vpop.eup %3382  ;;  %981 = vrot.lane.b32.xlu0 %v3697_v5, %s3558_s28 }
 0x10c   : > { %v3385_v8 = vpop.eup %3384  ;;  %v796_v12 = vmul.f32 %v3383_v7, %v3668_v28 }
 0x10d   : > { %v3387_v9 = vpop.eup %3386  ;;  %v794_v10 = vmul.f32 %v3385_v8, %v3670_v31 }
 0x10e   : > { %v3389_v11 = vpop.eup %3388  ;;  %v797_v13 = vmul.f32 %v3387_v9, %v3673_v34 }
 0x10f   : > { %v795_v14 = vmul.f32 %v3389_v11, %v739_v36  ;;  %983 = vrot.lane.b32.xlu0 %v3695_v4, %s3558_s28  ;;  %v3342_v15 = vpack.i.bf16 %v794_v10, %v793_v1  ;;  %v487_v36 = vand.u32 31, %v457_v29 }
 0x110   : > { %v3704_v16 = vpack.c.bf16 %v797_v13, %v796_v12  ;;  %v3332_v17 = vpack.i.bf16 %v797_v13, %v790_v2 }
 0x111   : > { %v3706_v18 = vpack.c.bf16 %v795_v14, %v794_v10  ;;  %v3347_v19 = vpack.i.bf16 %v796_v12, %v795_v14  ;;  %vm3735_vm7 = vcmp.ne.s32.totalorder %v487_v36, 31 }
 0x112   : > { %987 = vrot.lane.b32.xlu1 %v3704_v16, %s3558_s28 }
 0x113   : > { %3333 = vrot.lane.b32.xlu0 %v3332_v17, %s3558_s28 }
 0x116   : > { %985 = vrot.lane.b32.xlu1 %v3706_v18, %s3558_s28 }
 0x117   : > { %3343 = vrot.lane.b32.xlu0 %v3342_v15, %s3558_s28 }
 0x11a   : > { %3338 = vrot.lane.b32.xlu1 %v3337_v6, %s3558_s28 }
 0x11e   : > { %3348 = vrot.lane.b32.xlu1 %v3347_v19, %s3558_s28  ;;  %v515_v19 = vand.u32 31, %v461_v51  ;;  %s2846_s28 = sshll.u32 %s4248_s29, 3 }
 0x11f   : > { %s442_s15 = scalar_lea.vmem %s4238_s13, %s2846_s28 }
 0x120   : > { %vm3781_vm8 = vcmp.ne.s32.totalorder %v515_v19, 31 }
 0x17d   : > { %v982_v20 = vpop.permute.xlu0 %981 }
 0x17e   : > { %3091 = vmatprep.mubr.msk.bf16.mxu1 %vm895_vm2, %v982_v20 }
 0x181   : > { %v984_v23 = vpop.permute.xlu0 %983 }
 0x182   : > { %3092 = vmatmul.mubr.msk.bf16.vlgmr.msra.gmra.mrb[0].mxu1 %vm895_vm2, %v984_v23 }
 0x183   : > { %3100 = vmatpush3.bf16.msra.mxu1 %v1086_v21 }
 0x184   : > { %v988_v24 = vpop.permute.xlu1 %987 }
 0x185   : > { %v3334_v26 = vpop.permute.xlu0 %3333 }
 0x186   : > { %v3336_v27 = vunpack.i.h.bf16 %v3334_v26  ;;  %v3335_v28 = vunpack.i.l.bf16 %v3334_v26 }
 0x188   : > { %v986_v31 = vpop.permute.xlu1 %985  ;;  %v3718_v32 = vrot.slane %v3336_v27, 7  ;;  %v841_v33 = vrot.slane %v3335_v28, 7  ;;  %v866_v52 = vrot.slane %v3335_v28, 1  ;;  %v873_v15 = vrot.slane %v3336_v27, 1 }
 0x189   : > { %v3344_v34 = vpop.permute.xlu0 %3343  ;;  %3095 = vmatprep.mubr.msk.bf16.mxu1 %vm895_vm2, %v986_v31 }
 0x18a   : > { %v3346_v38 = vunpack.i.h.bf16 %v3344_v34  ;;  %v3345_v39 = vunpack.i.l.bf16 %v3344_v34  ;;  %3096 = vmatmul.mubr.msk.bf16.gmra.mrb[4].mxu1 %vm895_vm2, %v988_v24  ;;  %v857_v45 = vsel %vm849_vm3, %v3718_v32, %v841_v33  ;;  %v882_v27 = vsel %vm874_vm5, %v873_v15, %v866_v52 }
 0x18b   : > { %v858_v60 = vsel %vm3726_vm4, %v857_v45, 0.0  ;;  %v890_v34 = vsel %vm3781_vm8, %v882_v27, 0.0  ;;  %v2879_v45 = vld [vmem:[%s4231_s6] ss:$0 sm:$0xff] }
 0x18c   : > { %v845_v40 = vrot.slane %v3346_v38, 7  ;;  %v870_v41 = vrot.slane %v3346_v38, 1  ;;  %v844_v42 = vrot.slane %v3345_v39, 7  ;;  %v869_v43 = vrot.slane %v3345_v39, 1  ;;  %v3339_v44 = vpop.permute.xlu1 %3338 }
 0x18d   : > { %v3341_v46 = vunpack.i.h.bf16 %v3339_v44  ;;  %v3340_v47 = vunpack.i.l.bf16 %v3339_v44 }
 0x18e   : > { %v878_v53 = vsel %vm874_vm5, %v869_v43, %v870_v41  ;;  %v853_v56 = vsel %vm849_vm3, %v844_v42, %v845_v40 }
 0x18f   : > { %v843_v54 = vrot.slane %v3341_v46, 7  ;;  %v868_v55 = vrot.slane %v3341_v46, 1  ;;  %v842_v57 = vrot.slane %v3340_v47, 7  ;;  %v867_v58 = vrot.slane %v3340_v47, 1 }
 0x190   : > { %v3349_v59 = vpop.permute.xlu1 %3348  ;;  %v886_v1 = vsel %vm3735_vm7, %v878_v53, 0.0  ;;  %v862_v17 = vsel %vm3731_vm6, %v853_v56, 0.0 }
 0x191   : > { %v854_v61 = vsel %vm849_vm3, %v843_v54, %v844_v42  ;;  %v879_v62 = vsel %vm874_vm5, %v868_v55, %v869_v43  ;;  %v3351_v63 = vunpack.i.h.bf16 %v3349_v59  ;;  %v3350_v0 = vunpack.i.l.bf16 %v3349_v59 }
 0x192   : > { %v855_v2 = vsel %vm849_vm3, %v842_v57, %v843_v54  ;;  %v856_v3 = vsel %vm849_vm3, %v841_v33, %v842_v57  ;;  %v880_v6 = vsel %vm874_vm5, %v867_v58, %v868_v55  ;;  %v1070_v7 = vpack.c.bf16 %v886_v1, %v879_v62 }
 0x193   : > { %v881_v8 = vsel %vm874_vm5, %v866_v52, %v867_v58  ;;  %v892_v9 = vpack.c.bf16 %v854_v61, %v855_v2  ;;  %v872_v10 = vrot.slane %v3351_v63, 1  ;;  %v846_v11 = vrot.slane %v3350_v0, 7 }
 0x194   : > { %v871_v12 = vrot.slane %v3350_v0, 1  ;;  %v891_v13 = vpack.c.bf16 %v856_v3, %v858_v60  ;;  %v1069_v14 = vpack.c.bf16 %v880_v6, %v881_v8  ;;  %v847_v20 = vrot.slane %v3351_v63, 7 }
 0x195   : > { %v852_v21 = vsel %vm849_vm3, %v845_v40, %v846_v11  ;;  %v875_v31 = vsel %vm874_vm5, %v872_v10, %v873_v15  ;;  %v2878_v40 = vld [vmem:[%s4230_s5] ss:$0 sm:$0xff] }
 0x196   : > { %v876_v22 = vsel %vm874_vm5, %v871_v12, %v872_v10  ;;  %v877_v23 = vsel %vm874_vm5, %v870_v41, %v871_v12  ;;  %3081 = vmatprep.mubr.msk.bf16.mxu0 %vm895_vm2, %v891_v13  ;;  %3101 = vmatprep.mubr.msk.bf16.mxu1 %vm895_vm2, %v1069_v14  ;;  %v893_v24 = vpack.c.bf16 %v852_v21, %v862_v17 }
 0x197   : > { %3082 = vmatmul.mubr.msk.bf16.vlgmr.msra.gmra.mrb[8].mxu0 %vm895_vm2, %v892_v9  ;;  %v1071_v26 = vpack.c.bf16 %v876_v22, %v877_v23  ;;  %3102 = vmatmul.mubr.msk.bf16.vlgmr.msra.gmra.mrb[0].mxu1 %vm895_vm2, %v1070_v7  ;;  %v850_v28 = vsel %vm849_vm3, %v847_v20, %v3718_v32  ;;  %v851_v29 = vsel %vm849_vm3, %v846_v11, %v847_v20  ;;  %v2888_v32 = vld [vmem:[%s4229_s4 + $0xc] sm:$0xf] }
 0x198   : > { %3085 = vmatprep.mubr.msk.bf16.mxu0 %vm895_vm2, %v893_v24  ;;  %v894_v33 = vpack.c.bf16 %v850_v28, %v851_v29  ;;  %v1072_v35 = vpack.c.bf16 %v890_v34, %v875_v31  ;;  %3312 = vmatprep.subr.msk.bf16.mxu0 %vm908_vm1, %v2888_v32  ;;  %v1320_v36 = vsel %vm908_vm1, %v2888_v32, 0 }
 0x199   : > { %3105 = vmatprep.mubr.msk.bf16.mxu1 %vm895_vm2, %v1071_v26  ;;  %3110 = vmatpush3.bf16.msra.mxu0 %v1320_v36 }
 0x19a   : > { %3313 = vmatprep.subr.msk.bf16.mxu0 %vm908_vm1, %v3799_v37 }
 0x19f   : > { %3086 = vmatmul.mubr.msk.bf16.gmra.mrb[12].mxu0 %vm895_vm2, %v894_v33  ;;  %3106 = vmatmul.mubr.msk.bf16.gmra.mrb[4].mxu1 %vm895_vm2, %v1072_v35 }
 0x26a   : > { %v3083_v38 = vpop.f32.mrb[8].mxu0  ;;  %v3103_v39 = vpop.f32.mrb[0].mxu1 }
 0x26b   : > { %v946_v41 = vpop.f32.mrb[9].mxu0  ;;  %v3229_v42 = vadd.f32 %v3103_v39, %v3083_v38  ;;  %v1122_v43 = vpop.f32.mrb[1].mxu1 }
 0x26c   : > { %v3084_v44 = vpop.f32.mrb[10].mxu0  ;;  %v3230_v46 = vadd.f32 %v1122_v43, %v946_v41  ;;  %v3104_v47 = vpop.f32.mrb[2].mxu1 }
 0x26d   : > { %v949_v51 = vpop.f32.mrb[11].mxu0  ;;  %v1171_v52 = vmul.f32 %v3229_v42, %v2878_v40  ;;  %v3231_v53 = vadd.f32 %v3104_v47, %v3084_v44  ;;  %v1125_v54 = vpop.f32.mrb[3].mxu1 }
 0x26e   : > { %v1169_v55 = vmul.f32 %v3230_v46, %v2878_v40  ;;  %v3232_v56 = vadd.f32 %v1125_v54, %v949_v51 }
 0x26f   : > { %v3809_v57 = vadd.f32 %v2879_v45, %v1171_v52  ;;  %v1172_v58 = vmul.f32 %v3231_v53, %v2878_v40 }
 0x270   : > { %v3811_v59 = vadd.f32 %v2879_v45, %v1169_v55  ;;  %v1170_v60 = vmul.f32 %v3232_v56, %v2878_v40 }
 0x271   : > { %v2882_v61 = vmul.f32 -1.442695, %v3809_v57  ;;  %v3814_v62 = vadd.f32 %v2879_v45, %v1172_v58 }
 0x272   : > { %v3087_v63 = vpop.f32.mrb[12].mxu0  ;;  %v2880_v0 = vmul.f32 -1.442695, %v3811_v59  ;;  %v3817_v1 = vadd.f32 %v2879_v45, %v1170_v60  ;;  %v3107_v2 = vpop.f32.mrb[4].mxu1 }
 0x273   : > { %v962_v3 = vpop.f32.mrb[13].mxu0  ;;  %3390 = vpow2.f32 %v2882_v61  ;;  %v2883_v6 = vmul.f32 -1.442695, %v3814_v62  ;;  %v3233_v7 = vadd.f32 %v3107_v2, %v3087_v63  ;;  %v1138_v8 = vpop.f32.mrb[5].mxu1 }
 0x274   : > { %v3088_v9 = vpop.f32.mrb[14].mxu0  ;;  %3392 = vpow2.f32 %v2880_v0  ;;  %v2881_v10 = vmul.f32 -1.442695, %v3817_v1  ;;  %v3234_v11 = vadd.f32 %v1138_v8, %v962_v3  ;;  %v3108_v12 = vpop.f32.mrb[6].mxu1 }
 0x275   : > { %v965_v13 = vpop.f32.mrb[15].mxu0  ;;  %3394 = vpow2.f32 %v2883_v6  ;;  %v1175_v14 = vmul.f32 %v3233_v7, %v2878_v40  ;;  %v3235_v15 = vadd.f32 %v3108_v12, %v3088_v9  ;;  %v1141_v17 = vpop.f32.mrb[7].mxu1 }
 0x276   : > { %3396 = vpow2.f32 %v2881_v10  ;;  %v1173_v19 = vmul.f32 %v3234_v11, %v2878_v40  ;;  %v3236_v20 = vadd.f32 %v1141_v17, %v965_v13 }
 0x277   : > { %v3821_v21 = vadd.f32 %v2879_v45, %v1175_v14  ;;  %v1176_v22 = vmul.f32 %v3235_v15, %v2878_v40 }
 0x278   : > { %v3823_v23 = vadd.f32 %v2879_v45, %v1173_v19  ;;  %v1174_v24 = vmul.f32 %v3236_v20, %v2878_v40 }
 0x279   : > { %v2886_v26 = vmul.f32 -1.442695, %v3821_v21  ;;  %v3826_v27 = vadd.f32 %v2879_v45, %v1176_v22 }
 0x27a   : > { %v2884_v28 = vmul.f32 -1.442695, %v3823_v23  ;;  %v3829_v29 = vadd.f32 %v2879_v45, %v1174_v24 }
 0x27b   : > { %3398 = vpow2.f32 %v2886_v26  ;;  %v2887_v31 = vmul.f32 -1.442695, %v3826_v27 }
 0x27c   : > { %3400 = vpow2.f32 %v2884_v28  ;;  %v2885_v33 = vmul.f32 -1.442695, %v3829_v29 }
 0x27d   : > { %v3391_v34 = vpop.eup %3390  ;;  %3402 = vpow2.f32 %v2887_v31 }
 0x27e   : > { %v3393_v35 = vpop.eup %3392  ;;  %v1217_v32 = vadd.f32 1.0, %v3391_v34  ;;  %3404 = vpow2.f32 %v2885_v33  ;;  %v1400_v33 = vsel %vm908_vm1, %v3799_v37, 0 }
 0x27f   : > { %v3395_v36 = vpop.eup %3394  ;;  %v1215_v38 = vadd.f32 1.0, %v3393_v35 }
 0x280   : > { %v3397_v39 = vpop.eup %3396  ;;  %3406 = vrcp.f32 %v1217_v32  ;;  %v1218_v40 = vadd.f32 1.0, %v3395_v36 }
 0x281   : > { %3408 = vrcp.f32 %v1215_v38  ;;  %v1216_v41 = vadd.f32 1.0, %v3397_v39 }
 0x282   : > { %3410 = vrcp.f32 %v1218_v40 }
 0x283   : > { %3412 = vrcp.f32 %v1216_v41 }
 0x285   : > { %v3399_v42 = vpop.eup %3398 }
 0x286   : > { %v3401_v43 = vpop.eup %3400  ;;  %v1221_v44 = vadd.f32 1.0, %v3399_v42 }
 0x287   : > { %v3403_v45 = vpop.eup %3402  ;;  %v1219_v46 = vadd.f32 1.0, %v3401_v43 }
 0x288   : > { %v3405_v47 = vpop.eup %3404  ;;  %3414 = vrcp.f32 %v1221_v44  ;;  %v1222_v51 = vadd.f32 1.0, %v3403_v45 }
 0x289   : > { %3416 = vrcp.f32 %v1219_v46  ;;  %v1220_v52 = vadd.f32 1.0, %v3405_v47 }
 0x28a   : > { %v3407_v53 = vpop.eup %3406  ;;  %3418 = vrcp.f32 %v1222_v51 }
 0x28b   : > { %v3409_v54 = vpop.eup %3408  ;;  %v3834_v55 = vmul.f32 %v3407_v53, %v3809_v57  ;;  %3420 = vrcp.f32 %v1220_v52 }
 0x28c   : > { %v3411_v56 = vpop.eup %3410  ;;  %v3837_v58 = vmul.f32 %v3409_v54, %v3811_v59 }
 0x28d   : > { %v3413_v60 = vpop.eup %3412  ;;  %v3840_v61 = vmul.f32 %v3411_v56, %v3814_v62  ;;  %v1253_v63 = vrot.slane %v3834_v55, 7  ;;  %v1277_v0 = vrot.slane %v3834_v55, 1 }
 0x28e   : > { %v3845_v2 = vmul.f32 %v3413_v60, %v3817_v1  ;;  %v1251_v3 = vrot.slane %v3837_v58, 7  ;;  %v1275_v7 = vrot.slane %v3837_v58, 1 }
 0x28f   : > { %v1254_v57 = vrot.slane %v3840_v61, 7  ;;  %v1278_v6 = vrot.slane %v3840_v61, 1  ;;  %v1300_v59 = vpack.c.bf16 %v3840_v61, %v3834_v55 }
 0x290   : > { %v1252_v62 = vrot.slane %v3845_v2, 7  ;;  %v1276_v8 = vrot.slane %v3845_v2, 1  ;;  %v1299_v9 = vpack.c.bf16 %v3845_v2, %v3837_v58 }
 0x291   : > { %v1263_v1 = vsel %vm849_vm3, %v1253_v63, %v1254_v57  ;;  %v1287_v10 = vsel %vm874_vm5, %v1277_v0, %v1278_v6 }
 0x292   : > { %v3415_v11 = vpop.eup %3414  ;;  %v1264_v12 = vsel %vm849_vm3, %v1252_v62, %v1253_v63  ;;  %v1265_v13 = vsel %vm849_vm3, %v1251_v3, %v1252_v62  ;;  %v1288_v14 = vsel %vm874_vm5, %v1276_v8, %v1277_v0  ;;  %v1289_v15 = vsel %vm874_vm5, %v1275_v7, %v1276_v8  ;;  %v2890_v63 = vld [vmem:[%s4229_s4 + $0x14] sm:$0xf]  ;;  %v3933_v8 = vld [vmem:[%s4232_s7 + $0x4] sm:$0xf] }
 0x293   : > { %v3417_v17 = vpop.eup %3416  ;;  %v1304_v19 = vpack.c.bf16 %v1263_v1, %v1264_v12  ;;  %v1245_v20 = vmul.f32 %v3415_v11, %v3821_v21  ;;  %v1467_v22 = vpack.c.bf16 %v1288_v14, %v1289_v15  ;;  %v2905_v1 = vld [vmem:[%s4230_s5 + $0x1] ss:$0 sm:$0xff] }
 0x294   : > { %v3419_v24 = vpop.eup %3418  ;;  %v1243_v26 = vmul.f32 %v3417_v17, %v3823_v23  ;;  %v2906_v11 = vld [vmem:[%s4231_s6 + $0x1] ss:$0 sm:$0xff] }
 0x295   : > { %v3421_v28 = vpop.eup %3420  ;;  %v1246_v31 = vmul.f32 %v3419_v24, %v3826_v27  ;;  %v1257_v34 = vrot.slane %v1245_v20, 7  ;;  %v1281_v38 = vrot.slane %v1245_v20, 1 }
 0x296   : > { %v1255_v35 = vrot.slane %v1243_v26, 7  ;;  %v1279_v32 = vrot.slane %v1243_v26, 1  ;;  %v1244_v36 = vmul.f32 %v3421_v28, %v3829_v29 }
 0x297   : > { %v1258_v39 = vrot.slane %v1246_v31, 7  ;;  %v1282_v40 = vrot.slane %v1246_v31, 1  ;;  %v1302_v41 = vpack.c.bf16 %v1246_v31, %v1245_v20 }
 0x298   : > { %v1286_v21 = vsel %vm874_vm5, %v1278_v6, %v1279_v32  ;;  %v1256_v42 = vrot.slane %v1244_v36, 7  ;;  %v1280_v23 = vrot.slane %v1244_v36, 1  ;;  %v1262_v27 = vsel %vm849_vm3, %v1254_v57, %v1255_v35  ;;  %v800_v6 = vld [vmem:[%s4235_s10 + $0x8] sm:$0xf] }
 0x299   : > { %v1294_v37 = vsel %vm3735_vm7, %v1286_v21, 0.0  ;;  %v1266_v43 = vsel %vm849_vm3, %v1258_v39, %v1251_v3  ;;  %v1271_v29 = vsel %vm3731_vm6, %v1262_v27, 0.0  ;;  %v1259_v44 = vsel %vm849_vm3, %v1257_v34, %v1258_v39  ;;  %3315 = vmatprep.subr.msk.bf16.mxu1 %vm908_vm1, %v800_v6 }
 0x29a   : > { %v1267_v45 = vsel %vm3726_vm4, %v1266_v43, 0.0  ;;  %v1261_v46 = vsel %vm849_vm3, %v1255_v35, %v1256_v42  ;;  %v1260_v47 = vsel %vm849_vm3, %v1256_v42, %v1257_v34  ;;  %v1301_v51 = vpack.c.bf16 %v1244_v36, %v1243_v26 }
 0x29b   : > { %v1303_v52 = vpack.c.bf16 %v1265_v13, %v1267_v45  ;;  %v1305_v53 = vpack.c.bf16 %v1261_v46, %v1271_v29  ;;  %v1306_v54 = vpack.c.bf16 %v1259_v44, %v1260_v47  ;;  %v1468_v55 = vpack.c.bf16 %v1294_v37, %v1287_v10 }
 0x29c   : > { %v1284_v56 = vsel %vm874_vm5, %v1280_v23, %v1281_v38  ;;  %v1285_v58 = vsel %vm874_vm5, %v1279_v32, %v1280_v23  ;;  %v1283_v60 = vsel %vm874_vm5, %v1281_v38, %v1282_v40  ;;  %v1290_v61 = vsel %vm874_vm5, %v1282_v40, %v1275_v7  ;;  %v1814_v7 = vld [vmem:[%s4232_s7] sm:$0xf] }
 0x29d   : > { %3111 = vmatprep.mubr.msk.bf16.mxu0 %vm895_vm2, %v1303_v52  ;;  %v1469_v0 = vpack.c.bf16 %v1284_v56, %v1285_v58  ;;  %v1298_v2 = vsel %vm3781_vm8, %v1290_v61, 0.0  ;;  %v1484_v57 = vsel %vm908_vm1, %v2890_v63, 0  ;;  %v1882_v62 = vsel %vm908_vm1, %v1814_v7, 0 }
 0x29e   : > { %3112 = vmatmul.mubr.msk.bf16.vlgmr.msra.gmra.mrb[16].mxu0 %vm895_vm2, %v1304_v19  ;;  %v1470_v3 = vpack.c.bf16 %v1298_v2, %v1283_v60 }
 0x29f   : > { %3120 = vmatpush3.bf16.msra.mxu0 %v1400_v33  ;;  %3115 = vmatprep.mubr.msk.bf16.mxu0 %vm895_vm2, %v1305_v53 }
 0x2a0   : > { %3314 = vmatprep.subr.msk.bf16.mxu0 %vm908_vm1, %v2890_v63 }
 0x2a6   : > { %3116 = vmatmul.mubr.msk.bf16.gmra.mrb[20].mxu0 %vm895_vm2, %v1306_v54 }
 0x2a7   : > { %3121 = vmatprep.mubr.msk.bf16.mxu0 %vm895_vm2, %v1299_v9  ;;  %v3940_v9 = vld [vmem:[%s4235_s10] sm:$0xff]  }
 0x2ae   : > { %3122 = vmatmul.mubr.msk.bf16.vlgmr.msra.gmra.mrb[16].mxu0 %vm895_vm2, %v1300_v59  ;;  %v1664_v59 = vsel %vm908_vm1, %v800_v6, 0 }
 0x2af   : > { %3130 = vmatpush3.bf16.msra.mxu0 %v1484_v57  ;;  %3125 = vmatprep.mubr.msk.bf16.mxu0 %vm895_vm2, %v1301_v51 }
 0x2b0   : > { %3140 = vmatpush3.bf16.msra.mxu1 %v1664_v59  ;;  %3316 = vmatprep.subr.msk.bf16.mxu0 %vm908_vm1, %v1814_v7 }
 0x2b1   : > { %3149 = vmatprep.subr.bf16.mxu1 %v3940_v9 }
 0x2b6   : > { %3126 = vmatmul.mubr.msk.bf16.gmra.mrb[20].mxu0 %vm895_vm2, %v1302_v41 }
 0x2b7   : > { %3131 = vmatprep.mubr.msk.bf16.mxu0 %vm895_vm2, %v1467_v22 }
 0x2be   : > { %3132 = vmatmul.mubr.msk.bf16.vlgmr.msra.gmra.mrb[16].mxu0 %vm895_vm2, %v1468_v55 }
 0x2bf   : > { %3135 = vmatprep.mubr.msk.bf16.mxu0 %vm895_vm2, %v1469_v0  ;;  %3160 = vmatpush3.bf16.msra.mxu0 %v1882_v62 }
 0x2c0   : > { %3317 = vmatprep.subr.msk.bf16.mxu0 %vm908_vm1, %v3933_v8 }
 0x2c6   : > { %3136 = vmatmul.mubr.msk.bf16.gmra.mrb[20].mxu0 %vm895_vm2, %v1470_v3 }
 0x391   : > { %v3133_v10 = vpop.f32.mrb[16].mxu0 }
 0x392   : > { %v1571_v12 = vmul.f32 %v3133_v10, %v2905_v1  ;;  %v1520_v13 = vpop.f32.mrb[17].mxu0 }
 0x393   : > { %v1569_v14 = vmul.f32 %v2905_v1, %v1520_v13  ;;  %v3134_v15 = vpop.f32.mrb[18].mxu0 }
 0x394   : > { %v1585_v17 = vadd.f32 %v2906_v11, %v1571_v12  ;;  %v1572_v19 = vmul.f32 %v3134_v15, %v2905_v1  ;;  %v1523_v20 = vpop.f32.mrb[19].mxu0 }
 0x395   : > { %v1583_v22 = vadd.f32 %v2906_v11, %v1569_v14  ;;  %v1570_v24 = vmul.f32 %v2905_v1, %v1523_v20 }
 0x396   : > { %v2909_v26 = vmul.f32 -1.442695, %v1585_v17  ;;  %v1586_v28 = vadd.f32 %v2906_v11, %v1572_v19 }
 0x397   : > { %v2907_v31 = vmul.f32 -1.442695, %v1583_v22  ;;  %v1584_v33 = vadd.f32 %v2906_v11, %v1570_v24 }
 0x398   : > { %3422 = vpow2.f32 %v2909_v26  ;;  %v2910_v34 = vmul.f32 -1.442695, %v1586_v28 }
 0x399   : > { %3424 = vpow2.f32 %v2907_v31  ;;  %v2908_v35 = vmul.f32 -1.442695, %v1584_v33  ;;  %v3137_v32 = vpop.f32.mrb[20].mxu0 }
 0x39a   : > { %3426 = vpow2.f32 %v2910_v34  ;;  %v1575_v36 = vmul.f32 %v3137_v32, %v2905_v1  ;;  %v1536_v38 = vpop.f32.mrb[21].mxu0 }
 0x39b   : > { %3428 = vpow2.f32 %v2908_v35  ;;  %v1573_v39 = vmul.f32 %v2905_v1, %v1536_v38  ;;  %v3138_v40 = vpop.f32.mrb[22].mxu0 }
 0x39c   : > { %v3949_v41 = vadd.f32 %v2906_v11, %v1575_v36  ;;  %v1576_v21 = vmul.f32 %v3138_v40, %v2905_v1  ;;  %v1539_v42 = vpop.f32.mrb[23].mxu0 }
 0x39d   : > { %v3951_v23 = vadd.f32 %v2906_v11, %v1573_v39  ;;  %v1574_v27 = vmul.f32 %v2905_v1, %v1539_v42 }
 0x39e   : > { %v2913_v37 = vmul.f32 -1.442695, %v3949_v41  ;;  %v3954_v43 = vadd.f32 %v2906_v11, %v1576_v21 }
 0x39f   : > { %v2911_v29 = vmul.f32 -1.442695, %v3951_v23  ;;  %v3957_v44 = vadd.f32 %v2906_v11, %v1574_v27 }
 0x3a0   : > { %3430 = vpow2.f32 %v2913_v37  ;;  %v2914_v45 = vmul.f32 -1.442695, %v3954_v43 }
 0x3a1   : > { %3432 = vpow2.f32 %v2911_v29  ;;  %v2912_v46 = vmul.f32 -1.442695, %v3957_v44 }
 0x3a2   : > { %v3423_v47 = vpop.eup %3422  ;;  %3434 = vpow2.f32 %v2914_v45 }
 0x3a3   : > { %v3425_v51 = vpop.eup %3424  ;;  %v1617_v52 = vadd.f32 1.0, %v3423_v47  ;;  %3436 = vpow2.f32 %v2912_v46  ;;  %v1950_v47 = vsel %vm908_vm1, %v3933_v8, 0 }
 0x3a4   : > { %v3427_v53 = vpop.eup %3426  ;;  %v1615_v54 = vadd.f32 1.0, %v3425_v51 }
 0x3a5   : > { %v3429_v55 = vpop.eup %3428  ;;  %3438 = vrcp.f32 %v1617_v52  ;;  %v1618_v56 = vadd.f32 1.0, %v3427_v53 }
 0x3a6   : > { %3440 = vrcp.f32 %v1615_v54  ;;  %v1616_v58 = vadd.f32 1.0, %v3429_v55 }
 0x3a7   : > { %3442 = vrcp.f32 %v1618_v56 }
 0x3a8   : > { %3444 = vrcp.f32 %v1616_v58 }
 0x3aa   : > { %v3431_v60 = vpop.eup %3430 }
 0x3ab   : > { %v3433_v61 = vpop.eup %3432  ;;  %v1621_v63 = vadd.f32 1.0, %v3431_v60 }
 0x3ac   : > { %v3435_v0 = vpop.eup %3434  ;;  %v1619_v2 = vadd.f32 1.0, %v3433_v61 }
 0x3ad   : > { %v3437_v3 = vpop.eup %3436  ;;  %3446 = vrcp.f32 %v1621_v63  ;;  %v1622_v57 = vadd.f32 1.0, %v3435_v0 }
 0x3ae   : > { %3448 = vrcp.f32 %v1619_v2  ;;  %v1620_v6 = vadd.f32 1.0, %v3437_v3 }
 0x3af   : > { %v3439_v59 = vpop.eup %3438  ;;  %3450 = vrcp.f32 %v1622_v57 }
 0x3b0   : > { %v3441_v7 = vpop.eup %3440  ;;  %v1641_v62 = vmul.f32 %v3439_v59, %v1585_v17  ;;  %3452 = vrcp.f32 %v1620_v6 }
 0x3b1   : > { %v3443_v1 = vpop.eup %3442  ;;  %v3961_v10 = vmul.f32 %v3441_v7, %v1583_v22 }
 0x3b2   : > { %v3445_v11 = vpop.eup %3444  ;;  %v1642_v12 = vmul.f32 %v3443_v1, %v1586_v28  ;;  %v1819_v13 = vrot.slane %v1641_v62, 7  ;;  %v1843_v14 = vrot.slane %v1641_v62, 1 }
 0x3b3   : > { %v1640_v15 = vmul.f32 %v3445_v11, %v1584_v33  ;;  %v1817_v19 = vrot.slane %v3961_v10, 7  ;;  %v1841_v31 = vrot.slane %v3961_v10, 1 }
 0x3b4   : > { %v3964_v20 = vpack.c.bf16 %v1642_v12, %v1641_v62  ;;  %v1820_v24 = vrot.slane %v1642_v12, 7  ;;  %v1844_v26 = vrot.slane %v1642_v12, 1 }
 0x3b5   : > { %v1818_v34 = vrot.slane %v1640_v15, 7  ;;  %v1842_v35 = vrot.slane %v1640_v15, 1  ;;  %v3968_v17 = vpack.c.bf16 %v1640_v15, %v3961_v10 }
 0x3b6   : > { %v1829_v22 = vsel %vm849_vm3, %v1819_v13, %v1820_v24  ;;  %v1853_v28 = vsel %vm874_vm5, %v1843_v14, %v1844_v26 }
 0x3b7   : > { %v3447_v33 = vpop.eup %3446  ;;  %v1830_v32 = vsel %vm849_vm3, %v1818_v34, %v1819_v13  ;;  %3141 = vmatprep.mubr.msk.bf16.mxu1 %vm895_vm2, %v3968_v17  ;;  %v1831_v36 = vsel %vm849_vm3, %v1817_v19, %v1818_v34  ;;  %v3982_v38 = vsel %vm874_vm5, %v1842_v35, %v1843_v14  ;;  %v3986_v39 = vsel %vm874_vm5, %v1841_v31, %v1842_v35  ;;  %v1816_v13 = vld [vmem:[%s4232_s7 + $0x8] sm:$0xf] }
 0x3b8   : > { %v3449_v40 = vpop.eup %3448  ;;  %v1866_v21 = vpack.c.bf16 %v1829_v22, %v1830_v32  ;;  %v1645_v42 = vmul.f32 %v3447_v33, %v3949_v41  ;;  %3142 = vmatmul.mubr.msk.bf16.vlgmr.msra.gmra.mrb[8].mxu1 %vm895_vm2, %v3964_v20  ;;  %v2017_v27 = vpack.c.bf16 %v3982_v38, %v3986_v39 }
 0x3b9   : > { %v3451_v37 = vpop.eup %3450  ;;  %v1643_v29 = vmul.f32 %v3449_v40, %v3951_v23  ;;  %3150 = vmatpush3.bf16.msra.mxu1 %v3940_v9 }
 0x3ba   : > { %v3453_v45 = vpop.eup %3452  ;;  %v1646_v46 = vmul.f32 %v3451_v37, %v3954_v43  ;;  %v1823_v51 = vrot.slane %v1645_v42, 7  ;;  %v1847_v54 = vrot.slane %v1645_v42, 1 }
 0x3bb   : > { %v1821_v52 = vrot.slane %v1643_v29, 7  ;;  %v1845_v41 = vrot.slane %v1643_v29, 1  ;;  %v1644_v53 = vmul.f32 %v3453_v45, %v3957_v44 }
 0x3bc   : > { %v1824_v55 = vrot.slane %v1646_v46, 7  ;;  %v1848_v56 = vrot.slane %v1646_v46, 1  ;;  %v1650_v58 = vpack.c.bf16 %v1646_v46, %v1645_v42 }
 0x3bd   : > { %v1852_v23 = vsel %vm874_vm5, %v1844_v26, %v1845_v41  ;;  %v1822_v60 = vrot.slane %v1644_v53, 7  ;;  %v1846_v9 = vrot.slane %v1644_v53, 1  ;;  %v1649_v61 = vpack.c.bf16 %v1644_v53, %v1643_v29  ;;  %v2937_v26 = vld [vmem:[%s4234_s9] ss:$0 sm:$0xff] }
 0x3be   : > { %v1860_v43 = vsel %vm3735_vm7, %v1852_v23, 0.0  ;;  %v1832_v8 = vsel %vm849_vm3, %v1824_v55, %v1817_v19  ;;  %v1828_v63 = vsel %vm849_vm3, %v1820_v24, %v1821_v52  ;;  %v1825_v44 = vsel %vm849_vm3, %v1823_v51, %v1824_v55 }
 0x3bf   : > { %v2018_v0 = vpack.c.bf16 %v1860_v43, %v1853_v28  ;;  %3145 = vmatprep.mubr.msk.bf16.mxu1 %vm895_vm2, %v1649_v61  ;;  %v1833_v2 = vsel %vm3726_vm4, %v1832_v8, 0.0  ;;  %v1827_v3 = vsel %vm849_vm3, %v1821_v52, %v1822_v60  ;;  %v1837_v57 = vsel %vm3731_vm6, %v1828_v63, 0.0 }
 0x3c0   : > { %3146 = vmatmul.mubr.msk.bf16.gmra.mrb[12].mxu1 %vm895_vm2, %v1650_v58  ;;  %v1865_v6 = vpack.c.bf16 %v1831_v36, %v1833_v2  ;;  %v1867_v59 = vpack.c.bf16 %v1827_v3, %v1837_v57  ;;  %v1826_v7 = vsel %vm849_vm3, %v1822_v60, %v1823_v51  ;;  %v1850_v62 = vsel %vm874_vm5, %v1846_v9, %v1847_v54 }
 0x3c1   : > { %3151 = vmatprep.mubr.msk.bf16.mxu1 %vm634_vm0, %v3697_v5  ;;  %v1868_v1 = vpack.c.bf16 %v1825_v44, %v1826_v7  ;;  %v1851_v10 = vsel %vm874_vm5, %v1845_v41, %v1846_v9  ;;  %v1849_v11 = vsel %vm874_vm5, %v1847_v54, %v1848_v56  ;;  %v1856_v12 = vsel %vm874_vm5, %v1848_v56, %v1841_v31 }
 0x3c2   : > { %3161 = vmatprep.mubr.msk.bf16.mxu0 %vm895_vm2, %v1865_v6  ;;  %v2019_v14 = vpack.c.bf16 %v1850_v62, %v1851_v10  ;;  %v1864_v5 = vsel %vm3781_vm8, %v1856_v12, 0.0  ;;  %v2034_v19 = vsel %vm908_vm1, %v1816_v13, 0 }
 0x3c3   : > { %3162 = vmatmul.mubr.msk.bf16.vlgmr.msra.gmra.mrb[24].mxu0 %vm895_vm2, %v1866_v21  ;;  %v2020_v15 = vpack.c.bf16 %v1864_v5, %v1849_v11 }
 0x3c4   : > { %3170 = vmatpush3.bf16.msra.mxu0 %v1950_v47  ;;  %3165 = vmatprep.mubr.msk.bf16.mxu0 %vm895_vm2, %v1867_v59 }
 0x3c5   : > { %3318 = vmatprep.subr.msk.bf16.mxu0 %vm908_vm1, %v1816_v13 }
 0x3c8   : > { %3152 = vmatmul.mubr.msk.bf16.vlgmr.msra.gmra.mrb[8].mxu1 %vm634_vm0, %v3695_v4  ;;  %v2946_v4 = vld [vmem:[%s4232_s7 + $0xc] sm:$0xf] }
 0x3c9   : > { %3155 = vmatprep.mubr.msk.bf16.mxu1 %vm634_vm0, %v3706_v18  ;;  %3319 = vmatprep.subr.msk.bf16.mxu1 %vm908_vm1, %v2946_v4  ;;  %v4064_v18 = vld [vmem:[%s4232_s7 + $0x10] sm:$0xf] }
 0x3cb   : > { %3166 = vmatmul.mubr.msk.bf16.gmra.mrb[28].mxu0 %vm895_vm2, %v1868_v1 }
 0x3cc   : > { %3171 = vmatprep.mubr.msk.bf16.mxu0 %vm895_vm2, %v3968_v17 }
 0x3d0   : > { %3156 = vmatmul.mubr.msk.bf16.gmra.mrb[12].mxu1 %vm634_vm0, %v3704_v16  ;;  %v2268_v16 = vsel %vm908_vm1, %v2946_v4, 0 }
 0x3d1   : > { %3190 = vmatpush3.bf16.msra.mxu1 %v2268_v16 }
 0x3d2   : > { %3320 = vmatprep.subr.msk.bf16.mxu1 %vm908_vm1, %v4064_v18 }
 0x3d3   : > { %3172 = vmatmul.mubr.msk.bf16.vlgmr.msra.gmra.mrb[24].mxu0 %vm895_vm2, %v3964_v20  ;;  %v2936_v20 = vld [vmem:[%s4233_s8] ss:$0 sm:$0xff] }
 0x3d4   : > { %3180 = vmatpush3.bf16.msra.mxu0 %v2034_v19  ;;  %3175 = vmatprep.mubr.msk.bf16.mxu0 %vm895_vm2, %v1649_v61 }
 0x3db   : > { %3176 = vmatmul.mubr.msk.bf16.gmra.mrb[28].mxu0 %vm895_vm2, %v1650_v58 }
 0x3dc   : > { %3181 = vmatprep.mubr.msk.bf16.mxu0 %vm895_vm2, %v2017_v27 }
 0x3e3   : > { %3182 = vmatmul.mubr.msk.bf16.vlgmr.msra.gmra.mrb[24].mxu0 %vm895_vm2, %v2018_v0 }
 0x3e4   : > { %3185 = vmatprep.mubr.msk.bf16.mxu0 %vm895_vm2, %v2019_v14 }
 0x3eb   : > { %3186 = vmatmul.mubr.msk.bf16.gmra.mrb[28].mxu0 %vm895_vm2, %v2020_v15 }
 0x4b6   : > { %v3183_v24 = vpop.f32.mrb[24].mxu0 }
 0x4b7   : > { %v2119_v31 = vmul.f32 %v3183_v24, %v2936_v20  ;;  %v2070_v34 = vpop.f32.mrb[25].mxu0 }
 0x4b8   : > { %v2117_v35 = vmul.f32 %v2936_v20, %v2070_v34  ;;  %v3184_v17 = vpop.f32.mrb[26].mxu0 }
 0x4b9   : > { %v2133_v22 = vadd.f32 %v2937_v26, %v2119_v31  ;;  %v2120_v28 = vmul.f32 %v3184_v17, %v2936_v20  ;;  %v2073_v33 = vpop.f32.mrb[27].mxu0 }
 0x4ba   : > { %v2131_v32 = vadd.f32 %v2937_v26, %v2117_v35  ;;  %v2118_v36 = vmul.f32 %v2936_v20, %v2073_v33 }
 0x4bb   : > { %v2940_v38 = vmul.f32 -1.442695, %v2133_v22  ;;  %v2134_v39 = vadd.f32 %v2937_v26, %v2120_v28 }
 0x4bc   : > { %v2938_v40 = vmul.f32 -1.442695, %v2131_v32  ;;  %v2132_v21 = vadd.f32 %v2937_v26, %v2118_v36 }
 0x4bd   : > { %3454 = vpow2.f32 %v2940_v38  ;;  %v2941_v42 = vmul.f32 -1.442695, %v2134_v39 }
 0x4be   : > { %3456 = vpow2.f32 %v2938_v40  ;;  %v2939_v27 = vmul.f32 -1.442695, %v2132_v21  ;;  %v3187_v37 = vpop.f32.mrb[28].mxu0 }
 0x4bf   : > { %3458 = vpow2.f32 %v2941_v42  ;;  %v2123_v29 = vmul.f32 %v3187_v37, %v2936_v20  ;;  %v2086_v45 = vpop.f32.mrb[29].mxu0 }
 0x4c0   : > { %3460 = vpow2.f32 %v2939_v27  ;;  %v2121_v46 = vmul.f32 %v2936_v20, %v2086_v45  ;;  %v3188_v47 = vpop.f32.mrb[30].mxu0 }
 0x4c1   : > { %v4074_v51 = vadd.f32 %v2937_v26, %v2123_v29  ;;  %v2124_v52 = vmul.f32 %v3188_v47, %v2936_v20  ;;  %v2089_v41 = vpop.f32.mrb[31].mxu0 }
 0x4c2   : > { %v4076_v53 = vadd.f32 %v2937_v26, %v2121_v46  ;;  %v2122_v54 = vmul.f32 %v2936_v20, %v2089_v41 }
 0x4c3   : > { %v2944_v55 = vmul.f32 -1.442695, %v4074_v51  ;;  %v4079_v56 = vadd.f32 %v2937_v26, %v2124_v52 }
 0x4c4   : > { %v2942_v58 = vmul.f32 -1.442695, %v4076_v53  ;;  %v4082_v23 = vadd.f32 %v2937_v26, %v2122_v54  ;;  %v2348_v54 = vsel %vm908_vm1, %v4064_v18, 0 }
 0x4c5   : > { %3462 = vpow2.f32 %v2944_v55  ;;  %v2945_v60 = vmul.f32 -1.442695, %v4079_v56 }
 0x4c6   : > { %3464 = vpow2.f32 %v2942_v58  ;;  %v2943_v9 = vmul.f32 -1.442695, %v4082_v23 }
 0x4c7   : > { %v3455_v61 = vpop.eup %3454  ;;  %3466 = vpow2.f32 %v2945_v60 }
 0x4c8   : > { %v3457_v43 = vpop.eup %3456  ;;  %v2165_v8 = vadd.f32 1.0, %v3455_v61  ;;  %3468 = vpow2.f32 %v2943_v9 }
 0x4c9   : > { %v3459_v63 = vpop.eup %3458  ;;  %v2163_v44 = vadd.f32 1.0, %v3457_v43 }
 0x4ca   : > { %v3461_v0 = vpop.eup %3460  ;;  %3470 = vrcp.f32 %v2165_v8  ;;  %v2166_v2 = vadd.f32 1.0, %v3459_v63 }
 0x4cb   : > { %3472 = vrcp.f32 %v2163_v44  ;;  %v2164_v3 = vadd.f32 1.0, %v3461_v0 }
 0x4cc   : > { %3474 = vrcp.f32 %v2166_v2 }
 0x4cd   : > { %3476 = vrcp.f32 %v2164_v3 }
 0x4cf   : > { %v3463_v57 = vpop.eup %3462 }
 0x4d0   : > { %v3465_v6 = vpop.eup %3464  ;;  %v2169_v59 = vadd.f32 1.0, %v3463_v57 }
 0x4d1   : > { %v3467_v7 = vpop.eup %3466  ;;  %v2167_v62 = vadd.f32 1.0, %v3465_v6 }
 0x4d2   : > { %v3469_v1 = vpop.eup %3468  ;;  %3478 = vrcp.f32 %v2169_v59  ;;  %v2170_v10 = vadd.f32 1.0, %v3467_v7 }
 0x4d3   : > { %3480 = vrcp.f32 %v2167_v62  ;;  %v2168_v11 = vadd.f32 1.0, %v3469_v1 }
 0x4d4   : > { %v3471_v12 = vpop.eup %3470  ;;  %3482 = vrcp.f32 %v2170_v10 }
 0x4d5   : > { %v3473_v13 = vpop.eup %3472  ;;  %v4086_v14 = vmul.f32 %v3471_v12, %v2133_v22  ;;  %3484 = vrcp.f32 %v2168_v11  ;;  %v2948_v12 = vld [vmem:[%s4232_s7 + $0x14] sm:$0xf] }
 0x4d6   : > { %v3475_v5 = vpop.eup %3474  ;;  %v4088_v15 = vmul.f32 %v3473_v13, %v2131_v32  ;;  %v2432_v25 = vsel %vm908_vm1, %v2948_v12, 0 }
 0x4d7   : > { %v3477_v19 = vpop.eup %3476  ;;  %v4090_v4 = vmul.f32 %v3475_v5, %v2134_v39  ;;  %v2201_v16 = vrot.slane %v4086_v14, 7  ;;  %v2225_v20 = vrot.slane %v4086_v14, 1 }
 0x4d8   : > { %v4094_v24 = vmul.f32 %v3477_v19, %v2132_v21  ;;  %v2199_v26 = vrot.slane %v4088_v15, 7  ;;  %v2223_v17 = vrot.slane %v4088_v15, 1  ;;  %v2963_v19 = vld [vmem:[%s4233_s8 + $0x1] ss:$0 sm:$0xff] }
 0x4d9   : > { %v2202_v31 = vrot.slane %v4090_v4, 7  ;;  %v2226_v34 = vrot.slane %v4090_v4, 1  ;;  %v2248_v35 = vpack.c.bf16 %v4090_v4, %v4086_v14 }
 0x4da   : > { %v2200_v22 = vrot.slane %v4094_v24, 7  ;;  %v2224_v28 = vrot.slane %v4094_v24, 1  ;;  %v2247_v33 = vpack.c.bf16 %v4094_v24, %v4088_v15  ;;  %v2612_v15 = vsel %vm908_vm1, %v801_v30, 0 }
 0x4db   : > { %v2211_v32 = vsel %vm849_vm3, %v2201_v16, %v2202_v31  ;;  %v2235_v36 = vsel %vm874_vm5, %v2225_v20, %v2226_v34 }
 0x4dc   : > { %v3479_v38 = vpop.eup %3478  ;;  %v2212_v39 = vsel %vm849_vm3, %v2200_v22, %v2201_v16  ;;  %v2213_v40 = vsel %vm849_vm3, %v2199_v26, %v2200_v22  ;;  %v2236_v21 = vsel %vm874_vm5, %v2224_v28, %v2225_v20  ;;  %v2237_v42 = vsel %vm874_vm5, %v2223_v17, %v2224_v28  ;;  %v2964_v16 = vld [vmem:[%s4234_s9 + $0x1] ss:$0 sm:$0xff] }
 0x4dd   : > { %v3481_v27 = vpop.eup %3480  ;;  %v2252_v37 = vpack.c.bf16 %v2211_v32, %v2212_v39  ;;  %v2193_v29 = vmul.f32 %v3479_v38, %v4074_v51  ;;  %v2415_v45 = vpack.c.bf16 %v2236_v21, %v2237_v42 }
 0x4de   : > { %v3483_v46 = vpop.eup %3482  ;;  %v2191_v47 = vmul.f32 %v3481_v27, %v4076_v53 }
 0x4df   : > { %v3485_v52 = vpop.eup %3484  ;;  %v2194_v41 = vmul.f32 %v3483_v46, %v4079_v56  ;;  %v2205_v55 = vrot.slane %v2193_v29, 7  ;;  %v2229_v61 = vrot.slane %v2193_v29, 1 }
 0x4e0   : > { %v2203_v58 = vrot.slane %v2191_v47, 7  ;;  %v2227_v60 = vrot.slane %v2191_v47, 1  ;;  %v2192_v9 = vmul.f32 %v3485_v52, %v4082_v23 }
 0x4e1   : > { %v2206_v43 = vrot.slane %v2194_v41, 7  ;;  %v2230_v8 = vrot.slane %v2194_v41, 1  ;;  %v2250_v63 = vpack.c.bf16 %v2194_v41, %v2193_v29 }
 0x4e2   : > { %v2234_v51 = vsel %vm874_vm5, %v2226_v34, %v2227_v60  ;;  %v2204_v44 = vrot.slane %v2192_v9, 7  ;;  %v2228_v53 = vrot.slane %v2192_v9, 1  ;;  %v2210_v56 = vsel %vm849_vm3, %v2202_v31, %v2203_v58 }
 0x4e3   : > { %v2242_v18 = vsel %vm3735_vm7, %v2234_v51, 0.0  ;;  %v2214_v0 = vsel %vm849_vm3, %v2206_v43, %v2199_v26  ;;  %v2219_v23 = vsel %vm3731_vm6, %v2210_v56, 0.0  ;;  %v2207_v2 = vsel %vm849_vm3, %v2205_v55, %v2206_v43 }
 0x4e4   : > { %v2416_v3 = vpack.c.bf16 %v2242_v18, %v2235_v36  ;;  %v2215_v57 = vsel %vm3726_vm4, %v2214_v0, 0.0  ;;  %v2209_v6 = vsel %vm849_vm3, %v2203_v58, %v2204_v44  ;;  %v2208_v50 = vsel %vm849_vm3, %v2204_v44, %v2205_v55 }
 0x4e5   : > { %v2251_v59 = vpack.c.bf16 %v2213_v40, %v2215_v57  ;;  %v2253_v7 = vpack.c.bf16 %v2209_v6, %v2219_v23  ;;  %v2254_v62 = vpack.c.bf16 %v2207_v2, %v2208_v50  ;;  %v2249_v1 = vpack.c.bf16 %v2192_v9, %v2191_v47 }
 0x4e6   : > { %v2232_v49 = vsel %vm874_vm5, %v2228_v53, %v2229_v61  ;;  %v2233_v10 = vsel %vm874_vm5, %v2227_v60, %v2228_v53  ;;  %v2231_v48 = vsel %vm874_vm5, %v2229_v61, %v2230_v8  ;;  %v2238_v11 = vsel %vm874_vm5, %v2230_v8, %v2223_v17 }
 0x4e7   : > { %3191 = vmatprep.mubr.msk.bf16.mxu1 %vm895_vm2, %v2251_v59  ;;  %v2417_v13 = vpack.c.bf16 %v2232_v49, %v2233_v10  ;;  %v2246_v14 = vsel %vm3781_vm8, %v2238_v11, 0.0 }
 0x4e8   : > { %3192 = vmatmul.mubr.msk.bf16.vlgmr.msra.gmra.mrb[16].mxu1 %vm895_vm2, %v2252_v37  ;;  %v2418_v5 = vpack.c.bf16 %v2246_v14, %v2231_v48 }
 0x4e9   : > { %3200 = vmatpush3.bf16.msra.mxu1 %v2348_v54  ;;  %3195 = vmatprep.mubr.msk.bf16.mxu1 %vm895_vm2, %v2253_v7 }
 0x4ea   : > { %3321 = vmatprep.subr.msk.bf16.mxu1 %vm908_vm1, %v2948_v12 }
 0x4f0   : > { %3196 = vmatmul.mubr.msk.bf16.gmra.mrb[20].mxu1 %vm895_vm2, %v2254_v62 }
 0x4f1   : > { %3201 = vmatprep.mubr.msk.bf16.mxu1 %vm895_vm2, %v2247_v33 }
 0x4f8   : > { %3202 = vmatmul.mubr.msk.bf16.vlgmr.msra.gmra.mrb[16].mxu1 %vm895_vm2, %v2248_v35 }
 0x4f9   : > { %3210 = vmatpush3.bf16.msra.mxu1 %v2432_v25  ;;  %3205 = vmatprep.mubr.msk.bf16.mxu1 %vm895_vm2, %v2249_v1 }
 0x4fa   : > { %3322 = vmatprep.subr.msk.bf16.mxu1 %vm908_vm1, %v801_v30 }
 0x500   : > { %3206 = vmatmul.mubr.msk.bf16.gmra.mrb[20].mxu1 %vm895_vm2, %v2250_v63 }
 0x501   : > { %3211 = vmatprep.mubr.msk.bf16.mxu1 %vm895_vm2, %v2415_v45 }
 0x508   : > { %3212 = vmatmul.mubr.msk.bf16.vlgmr.msra.gmra.mrb[16].mxu1 %vm895_vm2, %v2416_v3 }
 0x509   : > { %3215 = vmatprep.mubr.msk.bf16.mxu1 %vm895_vm2, %v2417_v13  ;;  %3220 = vmatpush3.bf16.msra.mxu1 %v2612_v15 }
 0x510   : > { %3216 = vmatmul.mubr.msk.bf16.gmra.mrb[20].mxu1 %vm895_vm2, %v2418_v5 }
 0x5db   : > { %v3213_v4 = vpop.f32.mrb[16].mxu1 }
 0x5dc   : > { %v2519_v20 = vmul.f32 %v3213_v4, %v2963_v19  ;;  %v2468_v24 = vpop.f32.mrb[17].mxu1 }
 0x5dd   : > { %v2517_v26 = vmul.f32 %v2963_v19, %v2468_v24  ;;  %v3214_v31 = vpop.f32.mrb[18].mxu1 }
 0x5de   : > { %v4180_v34 = vadd.f32 %v2964_v16, %v2519_v20  ;;  %v2520_v35 = vmul.f32 %v3214_v31, %v2963_v19  ;;  %v2471_v17 = vpop.f32.mrb[19].mxu1  ;;  %v2977_v31 = vld [vmem:[%s4236_s11] ss:$0 sm:$0xff] }
 0x5df   : > { %v2531_v22 = vadd.f32 %v2964_v16, %v2517_v26  ;;  %v2518_v28 = vmul.f32 %v2963_v19, %v2471_v17 }
 0x5e0   : > { %v2967_v33 = vmul.f32 -1.442695, %v4180_v34  ;;  %v2534_v32 = vadd.f32 %v2964_v16, %v2520_v35  ;;  %v2978_v35 = vld [vmem:[%s4237_s12] ss:$0 sm:$0xff] }
 0x5e1   : > { %v2965_v36 = vmul.f32 -1.442695, %v2531_v22  ;;  %v2532_v38 = vadd.f32 %v2964_v16, %v2518_v28 }
 0x5e2   : > { %3486 = vpow2.f32 %v2967_v33  ;;  %v2968_v39 = vmul.f32 -1.442695, %v2534_v32 }
 0x5e3   : > { %3488 = vpow2.f32 %v2965_v36  ;;  %v2966_v40 = vmul.f32 -1.442695, %v2532_v38  ;;  %v3217_v21 = vpop.f32.mrb[20].mxu1 }
 0x5e4   : > { %3490 = vpow2.f32 %v2968_v39  ;;  %v2523_v42 = vmul.f32 %v3217_v21, %v2963_v19  ;;  %v2484_v27 = vpop.f32.mrb[21].mxu1 }
 0x5e5   : > { %3492 = vpow2.f32 %v2966_v40  ;;  %v2521_v37 = vmul.f32 %v2963_v19, %v2484_v27  ;;  %v3218_v29 = vpop.f32.mrb[22].mxu1 }
 0x5e6   : > { %v2537_v45 = vadd.f32 %v2964_v16, %v2523_v42  ;;  %v2524_v46 = vmul.f32 %v3218_v29, %v2963_v19  ;;  %v2487_v47 = vpop.f32.mrb[23].mxu1 }
 0x5e7   : > { %v2535_v52 = vadd.f32 %v2964_v16, %v2521_v37  ;;  %v2522_v41 = vmul.f32 %v2963_v19, %v2487_v47 }
 0x5e8   : > { %v2971_v54 = vmul.f32 -1.442695, %v2537_v45  ;;  %v2538_v55 = vadd.f32 %v2964_v16, %v2524_v46 }
 0x5e9   : > { %v2969_v58 = vmul.f32 -1.442695, %v2535_v52  ;;  %v2536_v60 = vadd.f32 %v2964_v16, %v2522_v41 }
 0x5ea   : > { %3494 = vpow2.f32 %v2971_v54  ;;  %v2972_v9 = vmul.f32 -1.442695, %v2538_v55 }
 0x5eb   : > { %3496 = vpow2.f32 %v2969_v58  ;;  %v2970_v61 = vmul.f32 -1.442695, %v2536_v60 }
 0x5ec   : > { %v3487_v43 = vpop.eup %3486  ;;  %3498 = vpow2.f32 %v2972_v9 }
 0x5ed   : > { %v3489_v8 = vpop.eup %3488  ;;  %v2565_v63 = vadd.f32 1.0, %v3487_v43  ;;  %3500 = vpow2.f32 %v2970_v61 }
 0x5ee   : > { %v3491_v51 = vpop.eup %3490  ;;  %v2563_v44 = vadd.f32 1.0, %v3489_v8 }
 0x5ef   : > { %v3493_v53 = vpop.eup %3492  ;;  %3502 = vrcp.f32 %v2565_v63  ;;  %v2566_v56 = vadd.f32 1.0, %v3491_v51 }
 0x5f0   : > { %3504 = vrcp.f32 %v2563_v44  ;;  %v2564_v18 = vadd.f32 1.0, %v3493_v53 }
 0x5f1   : > { %3506 = vrcp.f32 %v2566_v56 }
 0x5f2   : > { %3508 = vrcp.f32 %v2564_v18 }
 0x5f4   : > { %v3495_v0 = vpop.eup %3494 }
 0x5f5   : > { %v3497_v23 = vpop.eup %3496  ;;  %v2569_v2 = vadd.f32 1.0, %v3495_v0 }
 0x5f6   : > { %v3499_v3 = vpop.eup %3498  ;;  %v2567_v57 = vadd.f32 1.0, %v3497_v23 }
 0x5f7   : > { %v3501_v6 = vpop.eup %3500  ;;  %3510 = vrcp.f32 %v2569_v2  ;;  %v2570_v50 = vadd.f32 1.0, %v3499_v3 }
 0x5f8   : > { %3512 = vrcp.f32 %v2567_v57  ;;  %v2568_v59 = vadd.f32 1.0, %v3501_v6 }
 0x5f9   : > { %v3503_v7 = vpop.eup %3502  ;;  %3514 = vrcp.f32 %v2570_v50 }
 0x5fa   : > { %v3505_v62 = vpop.eup %3504  ;;  %3516 = vrcp.f32 %v2568_v59  ;;  %v2589_v10 = vmul.f32 %v3503_v7, %v4180_v34 }
 0x5fb   : > { %v3507_v1 = vpop.eup %3506  ;;  %v2587_v11 = vmul.f32 %v3505_v62, %v2531_v22 }
 0x5fc   : > { %v3509_v49 = vpop.eup %3508  ;;  %v2590_v48 = vmul.f32 %v3507_v1, %v2534_v32 }
 0x5fd   : > { %v2588_v12 = vmul.f32 %v3509_v49, %v2532_v38 }
 0x5fe   : > { %v2596_v13 = vpack.c.bf16 %v2590_v48, %v2589_v10 }
 0x5ff   : > { %v2595_v14 = vpack.c.bf16 %v2588_v12, %v2587_v11 }
 0x601   : > { %v3511_v5 = vpop.eup %3510  ;;  %3221 = vmatprep.mubr.msk.bf16.mxu1 %vm895_vm2, %v2595_v14 }
 0x602   : > { %v3513_v25 = vpop.eup %3512  ;;  %3222 = vmatmul.mubr.msk.bf16.vlgmr.msra.gmra.mrb[8].mxu1 %vm895_vm2, %v2596_v13  ;;  %v2593_v19 = vmul.f32 %v3511_v5, %v2537_v45 }
 0x603   : > { %v3515_v30 = vpop.eup %3514  ;;  %v2591_v16 = vmul.f32 %v3513_v25, %v2535_v52 }
 0x604   : > { %v3517_v15 = vpop.eup %3516  ;;  %v2594_v4 = vmul.f32 %v3515_v30, %v2538_v55 }
 0x605   : > { %v2592_v20 = vmul.f32 %v3517_v15, %v2536_v60 }
 0x606   : > { %v2598_v24 = vpack.c.bf16 %v2594_v4, %v2593_v19 }
 0x607   : > { %v2597_v26 = vpack.c.bf16 %v2592_v20, %v2591_v16 }
 0x609   : > { %3225 = vmatprep.mubr.msk.bf16.mxu1 %vm895_vm2, %v2597_v26 }
 0x60a   : > { %3226 = vmatmul.mubr.msk.bf16.gmra.mrb[12].mxu1 %vm895_vm2, %v2598_v24 }
 0x6d5   : > { %v3223_v34 = vpop.f32.mrb[8].mxu1 }
 0x6d6   : > { %v2697_v17 = vmul.f32 %v3223_v34, %v2977_v31  ;;  %v2648_v22 = vpop.f32.mrb[9].mxu1 }
 0x6d7   : > { %v2695_v28 = vmul.f32 %v2977_v31, %v2648_v22  ;;  %v3224_v33 = vpop.f32.mrb[10].mxu1 }
 0x6d8   : > { %v4194_v32 = vadd.f32 %v2978_v35, %v2697_v17  ;;  %v2698_v36 = vmul.f32 %v3224_v33, %v2977_v31  ;;  %v2651_v38 = vpop.f32.mrb[11].mxu1 }
 0x6d9   : > { %v4196_v39 = vadd.f32 %v2978_v35, %v2695_v28  ;;  %v2696_v40 = vmul.f32 %v2977_v31, %v2651_v38 }
 0x6da   : > { %v2981_v21 = vmul.f32 -1.442695, %v4194_v32  ;;  %v4199_v42 = vadd.f32 %v2978_v35, %v2698_v36 }
 0x6db   : > { %v2979_v27 = vmul.f32 -1.442695, %v4196_v39  ;;  %v4202_v37 = vadd.f32 %v2978_v35, %v2696_v40 }
 0x6dc   : > { %3518 = vpow2.f32 %v2981_v21  ;;  %v2982_v29 = vmul.f32 -1.442695, %v4199_v42 }
 0x6dd   : > { %3520 = vpow2.f32 %v2979_v27  ;;  %v2980_v45 = vmul.f32 -1.442695, %v4202_v37  ;;  %v3227_v46 = vpop.f32.mrb[12].mxu1 }
 0x6de   : > { %3522 = vpow2.f32 %v2982_v29  ;;  %v2701_v47 = vmul.f32 %v3227_v46, %v2977_v31  ;;  %v2664_v52 = vpop.f32.mrb[13].mxu1 }
 0x6df   : > { %3524 = vpow2.f32 %v2980_v45  ;;  %v2699_v41 = vmul.f32 %v2977_v31, %v2664_v52  ;;  %v3228_v54 = vpop.f32.mrb[14].mxu1 }
 0x6e0   : > { %v2715_v55 = vadd.f32 %v2978_v35, %v2701_v47  ;;  %v2702_v58 = vmul.f32 %v3228_v54, %v2977_v31  ;;  %v2667_v60 = vpop.f32.mrb[15].mxu1 }
 0x6e1   : > { %v2713_v9 = vadd.f32 %v2978_v35, %v2699_v41  ;;  %v2700_v61 = vmul.f32 %v2977_v31, %v2667_v60 }
 0x6e2   : > { %v2985_v43 = vmul.f32 -1.442695, %v2715_v55  ;;  %v2716_v8 = vadd.f32 %v2978_v35, %v2702_v58 }
 0x6e3   : > { %v2983_v63 = vmul.f32 -1.442695, %v2713_v9  ;;  %v2714_v51 = vadd.f32 %v2978_v35, %v2700_v61 }
 0x6e4   : > { %3526 = vpow2.f32 %v2985_v43  ;;  %v2986_v44 = vmul.f32 -1.442695, %v2716_v8 }
 0x6e5   : > { %3528 = vpow2.f32 %v2983_v63  ;;  %v2984_v53 = vmul.f32 -1.442695, %v2714_v51 }
 0x6e6   : > { %v3519_v56 = vpop.eup %3518  ;;  %3530 = vpow2.f32 %v2986_v44 }
 0x6e7   : > { %v3521_v18 = vpop.eup %3520  ;;  %v2743_v0 = vadd.f32 1.0, %v3519_v56  ;;  %3532 = vpow2.f32 %v2984_v53 }
 0x6e8   : > { %v3523_v23 = vpop.eup %3522  ;;  %v2741_v2 = vadd.f32 1.0, %v3521_v18 }
 0x6e9   : > { %v3525_v3 = vpop.eup %3524  ;;  %3534 = vrcp.f32 %v2743_v0  ;;  %v2744_v57 = vadd.f32 1.0, %v3523_v23 }
 0x6ea   : > { %3536 = vrcp.f32 %v2741_v2  ;;  %v2742_v6 = vadd.f32 1.0, %v3525_v3 }
 0x6eb   : > { %3538 = vrcp.f32 %v2744_v57 }
 0x6ec   : > { %3540 = vrcp.f32 %v2742_v6 }
 0x6ee   : > { %v3527_v50 = vpop.eup %3526 }
 0x6ef   : > { %v3529_v59 = vpop.eup %3528  ;;  %v2747_v7 = vadd.f32 1.0, %v3527_v50 }
 0x6f0   : > { %v3531_v62 = vpop.eup %3530  ;;  %v2745_v1 = vadd.f32 1.0, %v3529_v59 }
 0x6f1   : > { %v3533_v49 = vpop.eup %3532  ;;  %3542 = vrcp.f32 %v2747_v7  ;;  %v2748_v10 = vadd.f32 1.0, %v3531_v62 }
 0x6f2   : > { %3544 = vrcp.f32 %v2745_v1  ;;  %v2746_v48 = vadd.f32 1.0, %v3533_v49 }
 0x6f3   : > { %v3535_v11 = vpop.eup %3534  ;;  %3546 = vrcp.f32 %v2748_v10 }
 0x6f4   : > { %v3537_v12 = vpop.eup %3536  ;;  %v2767_v13 = vmul.f32 %v3535_v11, %v4194_v32  ;;  %3548 = vrcp.f32 %v2746_v48 }
 0x6f5   : > { %v3539_v14 = vpop.eup %3538  ;;  %v2765_v5 = vmul.f32 %v3537_v12, %v4196_v39 }
 0x6f6   : > { %v3541_v25 = vpop.eup %3540  ;;  %2776 = vst.msk [vmem:[%s442_s15 + $0x10] sm:$0xff] %vm2773_vm9, %v2767_v13  ;;  %v2768_v30 = vmul.f32 %v3539_v14, %v4199_v42 }
 0x6f7   : > { %2774 = vst.msk [vmem:[%s442_s15] sm:$0xff] %vm2773_vm9, %v2765_v5  ;;  %v2766_v15 = vmul.f32 %v3541_v25, %v4202_v37 }
 0x6f8   : > { %2777 = vst.msk [vmem:[%s442_s15 + $0x18] sm:$0xff] %vm2773_vm9, %v2768_v30 }
 0x6f9   : > { %2775 = vst.msk [vmem:[%s442_s15 + $0x8] sm:$0xff] %vm2773_vm9, %v2766_v15 }
 0x6fb   : > { %v3543_v19 = vpop.eup %3542 }
 0x6fc   : > { %v3545_v4 = vpop.eup %3544  ;;  %v2771_v16 = vmul.f32 %v3543_v19, %v2715_v55 }
 0x6fd   : > { %v3547_v20 = vpop.eup %3546  ;;  %v2769_v24 = vmul.f32 %v3545_v4, %v2713_v9 }
 0x6fe   : > { %v3549_v26 = vpop.eup %3548  ;;  %2780 = vst.msk [vmem:[%s442_s15 + $0x30] sm:$0xff] %vm2773_vm9, %v2771_v16  ;;  %v2772_v31 = vmul.f32 %v3547_v20, %v2716_v8 }
 0x6ff   : > { %2778 = vst.msk [vmem:[%s442_s15 + $0x20] sm:$0xff] %vm2773_vm9, %v2769_v24  ;;  %v2770_v34 = vmul.f32 %v3549_v26, %v2714_v51 }
 0x700   : > { %2781 = vst.msk [vmem:[%s442_s15 + $0x38] sm:$0xff] %vm2773_vm9, %v2772_v31 }
 0x701   : > { %2779 = vst.msk [vmem:[%s442_s15 + $0x28] sm:$0xff] %vm2773_vm9, %v2770_v34 }
 0x702 PF: > { %s23_s25 = sadd.s32 1, %s3556_s25  }
 0x703   : > { %p20_p4 = scmp.ge.s32.totalorder %s23_s25, 4  }
 0x705   :  { %22 = sbr.rel (!%p20_p4) target bundleno = 1 (0x1), region = 108 }

</bundles_post_ra>
